<compile_context>
chip_gen: v6e
topology: v6e:2x2x1
jax: 0.10.0
libtpu: 0.0.40
codegen_flags: <defaults>
</compile_context>

<pallas_src>
import jax
import jax.numpy as jnp
from jax.experimental import pallas as pl
from jax.experimental.pallas import tpu as pltpu


def _decoder_kernel(zc_ref, w0_ref, w1_ref, w2_ref, o_ref):
    # zc: (bm, in) bf16; w0: (in, H); w1: (H, H); w2: (H, x_pad) -- all bf16.
    # Three dependent MXU matmuls, f32 accumulation throughout.
    cdt = w1_ref.dtype
    h0 = jnp.dot(zc_ref[...], w0_ref[...], preferred_element_type=jnp.float32)
    h0 = jnp.maximum(h0, 0.0)            # A0 ReLU; D0 dropout = identity (eval)
    h1 = jnp.dot(h0.astype(cdt), w1_ref[...],
                 preferred_element_type=jnp.float32)
    h1 = jnp.maximum(h1, 0.0)            # A1 ReLU
    out = jnp.dot(h1.astype(cdt), w2_ref[...],
                  preferred_element_type=jnp.float32)
    o_ref[...] = out.astype(o_ref.dtype)


def prepare_decoder_weights(w0_t, w1_t, w2_t, *, weight_dtype=jnp.bfloat16):
    """One-time preprocessing OUTSIDE the hot path.

    Weights are expected pre-transposed: (in_features, out_features), i.e. the
    PyTorch `weight.T`.
      - cast to bf16 (MXU-native, halves weight HBM/VMEM traffic),
      - zero-pad W2's output columns up to a multiple of 128 (lane-dense,
        unmasked stores).  Padded lanes are exactly zero and sliced off later.
    """
    x_dim = w2_t.shape[1]
    x_pad = ((x_dim + 127) // 128) * 128
    w2p = jnp.pad(w2_t, ((0, 0), (0, x_pad - x_dim))) if x_pad != x_dim else w2_t
    return (w0_t.astype(weight_dtype),
            w1_t.astype(weight_dtype),
            w2p.astype(weight_dtype))


def decoder_forward(z, c, weights, *, x_dim, conditional=True, bm=None,
                    compute_dtype=jnp.bfloat16, out_dtype=jnp.float32,
                    trim_output=True, single_buffer_weights=False):
    """Fused Decoder forward. `weights` from prepare_decoder_weights().

    bm: batch tile.  Default 256 (fills the 256-row MXU on v6e/v7x).  When
        B <= bm a single whole-batch tile (rounded up to a multiple of 8) is
        used -- best on v5e where extra grid steps are purely serial overhead.
        For large batches on v7x keep Bp // bm >= 2 so the "parallel" axis
        feeds both TensorCores.
    out_dtype / trim_output: set out_dtype=jnp.bfloat16 and/or
        trim_output=False to cut the output HBM stream if downstream allows.
    """
    w0, w1, w2 = weights
    in_dim, hidden = w0.shape
    x_pad = w2.shape[1]

    # One-time tiny concat + bf16 cast in the wrapper (outside the kernel).
    zc = jnp.concatenate([z, c], axis=-1) if conditional else z
    assert zc.shape[1] == in_dim, (zc.shape, in_dim)
    zc = zc.astype(compute_dtype)
    B = zc.shape[0]

    if bm is None:
        bm = 256
    bm = max(8, ((bm + 7) // 8) * 8)          # keep dense (8,128) sublane tiling
    if B <= bm:
        bm = max(8, ((B + 7) // 8) * 8)       # single whole-batch tile
    pad_b = (-B) % bm
    if pad_b:
        zc = jnp.pad(zc, ((0, pad_b), (0, 0)))
    Bp = B + pad_b

    def weight_spec(shape):
        kw = {}
        if single_buffer_weights:
            # Constant index_map already avoids per-step re-DMA; this only
            # trims the unused second buffer's VMEM.
            kw["pipeline_mode"] = pl.Buffered(1)
        return pl.BlockSpec(shape, lambda i: (0, 0), **kw)

    in_specs = [
        pl.BlockSpec((bm, in_dim), lambda i: (i, 0)),
        weight_spec((in_dim, hidden)),
        weight_spec((hidden, hidden)),
        weight_spec((hidden, x_pad)),
    ]
    out_specs = pl.BlockSpec((bm, x_pad), lambda i: (i, 0))

    # Advisory cost hint for XLA's scheduler around the custom call.
    flops = 2 * Bp * (in_dim * hidden + hidden * hidden + hidden * x_pad)
    bytes_accessed = int(zc.size) * zc.dtype.itemsize
    bytes_accessed += sum(int(w.size) * w.dtype.itemsize for w in (w0, w1, w2))
    bytes_accessed += int(Bp) * int(x_pad) * jnp.dtype(out_dtype).itemsize
    cost = pl.CostEstimate(flops=flops, transcendentals=0,
                           bytes_accessed=bytes_accessed)

    grid_spec = pltpu.PrefetchScalarGridSpec(
        num_scalar_prefetch=0,
        grid=(Bp // bm,),
        in_specs=in_specs,
        out_specs=out_specs,
    )

    out = pl.pallas_call(
        _decoder_kernel,
        out_shape=jax.ShapeDtypeStruct((Bp, x_pad), out_dtype),
        grid_spec=grid_spec,
        compiler_params=pltpu.CompilerParams(
            dimension_semantics=("parallel",)),
        cost_estimate=cost,
    )(zc, w0, w1, w2)

    if trim_output:
        return out[:B, :x_dim]
    return out


def _reference_forward_f32(z, c, w0_t, w1_t, w2_t, conditional=True):
    zc = jnp.concatenate([z, c], axis=-1) if conditional else z
    h0 = jnp.maximum(zc @ w0_t, 0.0)
    h1 = jnp.maximum(h0 @ w1_t, 0.0)
    return h1 @ w2_t


def _reference_forward_matched(z, c, weights, *, x_dim, conditional=True):
    """Mirrors the kernel's bf16-operand / f32-accumulate numerics."""
    w0, w1, w2 = weights
    zc = (jnp.concatenate([z, c], axis=-1) if conditional else z)
    zc = zc.astype(jnp.bfloat16)
    h0 = jnp.maximum(jnp.dot(zc, w0, preferred_element_type=jnp.float32), 0.0)
    h1 = jnp.maximum(jnp.dot(h0.astype(jnp.bfloat16), w1,
                             preferred_element_type=jnp.float32), 0.0)
    out = jnp.dot(h1.astype(jnp.bfloat16), w2,
                  preferred_element_type=jnp.float32)
    return out[:, :x_dim]


def _check(out, z, c, weights, w0_t, w1_t, w2_t, x_dim, conditional):
    ref_m = _reference_forward_matched(z, c, weights, x_dim=x_dim,
                                       conditional=conditional)
    assert jnp.allclose(out, ref_m, atol=1e-2, rtol=1e-2), \
        "mismatch vs bf16-matched reference"
    ref_f = _reference_forward_f32(z, c, w0_t, w1_t, w2_t,
                                   conditional=conditional)
    assert jnp.allclose(out, ref_f, atol=1e-1, rtol=1e-1), \
        "mismatch vs f32 reference"


if __name__ == "__main__":
    # Module config (consistent with the PyTorch __init__)
    x_dim = 32
    latent_size = 8
    condition_dim = 24
    conditional = True
    hidden = 512
    input_size = latent_size + condition_dim if conditional else latent_size

    key = jax.random.PRNGKey(0)
    k_z, k_c, k0, k1, k2, k_z2, k_c2 = jax.random.split(key, 7)

    # Deterministic synthetic weights, pre-transposed: (in_features, out_features)
    w0_t = jax.random.normal(k0, (input_size, hidden), dtype=jnp.float32) * 0.05
    w1_t = jax.random.normal(k1, (hidden, hidden), dtype=jnp.float32) * 0.05
    w2_t = jax.random.normal(k2, (hidden, x_dim), dtype=jnp.float32) * 0.05

    # One-time weight prep (bf16 cast, lane-dense 128-pad of W2).
    weights = prepare_decoder_weights(w0_t, w1_t, w2_t)

    # Case 1: batch=512 with default bm=256 -> 2 "parallel" grid steps
    # (both TCs on v7x; full 256-row MXU occupancy per step).
    batch = 512
    z = jax.random.normal(k_z, (batch, latent_size), dtype=jnp.float32)
    c = jax.random.normal(k_c, (batch, condition_dim), dtype=jnp.float32)
    out = decoder_forward(z, c, weights, x_dim=x_dim, conditional=conditional)
    out = jax.block_until_ready(out)
    assert out.shape == (batch, x_dim)
    _check(out, z, c, weights, w0_t, w1_t, w2_t, x_dim, conditional)

    # Case 2: small ragged batch (37) -> single whole-batch tile rounded up
    # to a multiple of 8 (dense sublane layout, grid of 1).
    batch2 = 37
    z2 = jax.random.normal(k_z2, (batch2, latent_size), dtype=jnp.float32)
    c2 = jax.random.normal(k_c2, (batch2, condition_dim), dtype=jnp.float32)
    out2 = decoder_forward(z2, c2, weights, x_dim=x_dim, conditional=conditional)
    out2 = jax.block_until_ready(out2)
    assert out2.shape == (batch2, x_dim)
    _check(out2, z2, c2, weights, w0_t, w1_t, w2_t, x_dim, conditional)

    print("KERNEL_OK")
</pallas_src>

<mosaic_0001>
module attributes {stable_mosaic.version = 11 : i64} {
  func.func @_decoder_kernel(%arg0: i32, %arg1: memref<256x32xbf16, #tpu.memory_space<vmem>>, %arg2: memref<32x512xbf16, #tpu.memory_space<vmem>>, %arg3: memref<512x512xbf16, #tpu.memory_space<vmem>>, %arg4: memref<512x128xbf16, #tpu.memory_space<vmem>>, %arg5: memref<256x128xf32, #tpu.memory_space<vmem>>) attributes {dimension_semantics = [#tpu.dimension_semantics<parallel>], iteration_bounds = array<i64: 2>, scalar_prefetch = 0 : i64, scratch_operands = 0 : i64, tpu.core_type = #tpu.core_type<tc>, window_params = [{transform_indices = @transform_0, window_bounds = array<i64: 256, 32>}, {pipeline_mode = #tpu.pipeline_mode<synchronous>, transform_indices = @transform_1, window_bounds = array<i64: 32, 512>}, {pipeline_mode = #tpu.pipeline_mode<synchronous>, transform_indices = @transform_2, window_bounds = array<i64: 512, 512>}, {pipeline_mode = #tpu.pipeline_mode<synchronous>, transform_indices = @transform_3, window_bounds = array<i64: 512, 128>}, {transform_indices = @transform_4, window_bounds = array<i64: 256, 128>}]} {
    %c0 = arith.constant 0 : index
    %c0_0 = arith.constant 0 : index
    %0 = vector.load %arg1[%c0, %c0_0] : memref<256x32xbf16, #tpu.memory_space<vmem>>, vector<256x32xbf16>
    %c0_1 = arith.constant 0 : index
    %c0_2 = arith.constant 0 : index
    %1 = vector.load %arg2[%c0_1, %c0_2] : memref<32x512xbf16, #tpu.memory_space<vmem>>, vector<32x512xbf16>
    %cst = arith.constant dense<0.000000e+00> : vector<256x512xf32>
    %2 = tpu.matmul %0, %1, %cst {dimension_numbers = #tpu.dot_dimension_numbers<[1], [0], [0], [1], [0, 0, 1, 1], [], []>} : vector<256x32xbf16>, vector<32x512xbf16>, vector<256x512xf32> -> vector<256x512xf32>
    %cst_3 = arith.constant 0.000000e+00 : f32
    %3 = vector.broadcast %cst_3 : f32 to vector<256x512xf32>
    %4 = arith.maximumf %2, %3 : vector<256x512xf32>
    %5 = arith.truncf %4 : vector<256x512xf32> to vector<256x512xbf16>
    %c0_4 = arith.constant 0 : index
    %c0_5 = arith.constant 0 : index
    %6 = vector.load %arg3[%c0_4, %c0_5] : memref<512x512xbf16, #tpu.memory_space<vmem>>, vector<512x512xbf16>
    %cst_6 = arith.constant dense<0.000000e+00> : vector<256x512xf32>
    %7 = tpu.matmul %5, %6, %cst_6 {dimension_numbers = #tpu.dot_dimension_numbers<[1], [0], [0], [1], [0, 0, 1, 1], [], []>} : vector<256x512xbf16>, vector<512x512xbf16>, vector<256x512xf32> -> vector<256x512xf32>
    %cst_7 = arith.constant 0.000000e+00 : f32
    %8 = vector.broadcast %cst_7 : f32 to vector<256x512xf32>
    %9 = arith.maximumf %7, %8 : vector<256x512xf32>
    %10 = arith.truncf %9 : vector<256x512xf32> to vector<256x512xbf16>
    %c0_8 = arith.constant 0 : index
    %c0_9 = arith.constant 0 : index
    %11 = vector.load %arg4[%c0_8, %c0_9] : memref<512x128xbf16, #tpu.memory_space<vmem>>, vector<512x128xbf16>
    %cst_10 = arith.constant dense<0.000000e+00> : vector<256x128xf32>
    %12 = tpu.matmul %10, %11, %cst_10 {dimension_numbers = #tpu.dot_dimension_numbers<[1], [0], [0], [1], [0, 0, 1, 1], [], []>} : vector<256x512xbf16>, vector<512x128xbf16>, vector<256x128xf32> -> vector<256x128xf32>
    %c0_11 = arith.constant 0 : index
    %c0_12 = arith.constant 0 : index
    %13 = vector.load %arg5[%c0_11, %c0_12] : memref<256x128xf32, #tpu.memory_space<vmem>>, vector<256x128xf32>
    tpu.vector_store %arg5[%c0_11, %c0_12], %12 {strides = array<i32>} : memref<256x128xf32, #tpu.memory_space<vmem>>, vector<256x128xf32>,
    return
  }
  func.func @transform_0(%arg0: i32) -> (i32, i32) {
    %c0_i32 = arith.constant 0 : i32
    %c0_i32_0 = arith.constant 0 : i32
    return %arg0, %c0_i32 : i32, i32
  }
  func.func @transform_1(%arg0: i32) -> (i32, i32) {
    %c0_i32 = arith.constant 0 : i32
    %c0_i32_0 = arith.constant 0 : i32
    %c0_i32_1 = arith.constant 0 : i32
    return %c0_i32, %c0_i32_0 : i32, i32
  }
  func.func @transform_2(%arg0: i32) -> (i32, i32) {
    %c0_i32 = arith.constant 0 : i32
    %c0_i32_0 = arith.constant 0 : i32
    %c0_i32_1 = arith.constant 0 : i32
    return %c0_i32, %c0_i32_0 : i32, i32
  }
  func.func @transform_3(%arg0: i32) -> (i32, i32) {
    %c0_i32 = arith.constant 0 : i32
    %c0_i32_0 = arith.constant 0 : i32
    %c0_i32_1 = arith.constant 0 : i32
    return %c0_i32, %c0_i32_0 : i32, i32
  }
  func.func @transform_4(%arg0: i32) -> (i32, i32) {
    %c0_i32 = arith.constant 0 : i32
    %c0_i32_0 = arith.constant 0 : i32
    return %arg0, %c0_i32 : i32, i32
  }
}

</mosaic_0001>

<bundles_post_ra>
// kernel: tpu_custom_call.1
= control target key start
LH: loop header
LB: loop body
LE: loop exit
PB: predicated region body
PF: predicated region fallthrough
CT: control target
= control target key end

     0   :  { %9 = vsyncpa [#allocation3], 0  ;;  %s5417_s0 = inlined_call_operand.vmem [shape: bf16[512,32], index: 0, kind: input, shape index: {}]   ;;  %s5418_s1 = inlined_call_operand.vmem [shape: bf16[32,512], index: 1, kind: input, shape index: {}]   ;;  %s5419_s2 = inlined_call_operand.hbm [shape: bf16[512,512], index: 2, kind: input, shape index: {}]   ;;  %s5420_s3 = inlined_call_operand.vmem [shape: bf16[512,128], index: 3, kind: input, shape index: {}]   ;;  %s5421_s4 = inlined_call_operand.hbm [shape: f32[512,128], index: 4, kind: output, shape index: {}]  }
   0x1   :  { %10 = vsyncpa [#allocation4], 0 }
   0x2   :  { %12 = vsyncpa [#allocation4 + $0x1], 0  ;;  %s4318_s15 = smov 0   ;;  %s4320_s16 = smov 0  }
   0x3   :  { %s4322_s17 = smov 0   ;;  %s4324_s18 = smov 0  }
   0x4 LB: > { %s4339_s19 = sadd.s32 4294967295, %s4284_s18   ;;  %s3432_s20 = sadd.s32 4294967294, %s4284_s18   ;;  %s4284_s18 = sphi %s4324_s18, %s5485_s18   ;;  %s4280_s17 = sphi %s4322_s17, %s5484_s17   ;;  %s4276_s16 = sphi %s4320_s16, %s5483_s16   ;;  %s4272_s15 = sphi %s4318_s15, %s5482_s15  }
   0x5   : > { %s4343_s21 = sadd.s32 1, %s4284_s18   ;;  %s114_s22 = sadd.s32 1, %s4280_s17 }
   0x6   : > { %s111_s23 = ssub.s32 %s4284_s18, %s4343_s21  ;;  %p124_p0 = scmp.ne.s32.totalorder %s4280_s17, %s4276_s16 }
   0x7   : > { %p112_p1 = scmp.eq.s32.totalorder %s111_s23, 0  ;;  %p125_p2 = scmp.eq.s32.totalorder %s4339_s19, 1 }
   0x8   : > { %p130_p3 = scmp.ne.s32.totalorder %s4276_s16, %s4272_s15  ;;  %p131_p4 = scmp.eq.s32.totalorder %s3432_s20, 1 }
   0x9   : > { %s4354_s24 = scalar_select %p112_p1, %s4280_s17, %s114_s22  }
   0xa   : > { %p4356_p5 = por %p125_p2, %p124_p0  ;;  %p4360_p6 = por %p131_p4, %p130_p3 }
   0xb   : > { %p3433_p7 = scmp.ge.s32.totalorder %s4284_s18, 1  ;;  %p138_p8 = scmp.lt.s32.totalorder %s4284_s18, 3 }
   0xc   : > { %s5439_s26 = scalar_select %p4360_p6, 1, 0 }
   0xd   : > { %p3901_p9 = scmp.eq.s32.totalorder %s4339_s19, 0  ;;  %p4367_p10 = pnand %p3433_p7, %p138_p8 }
   0xe   : > { %s4286_s28 = smov [#allocation2]  }
   0xf   : > { %s153_s29 = sshll.u32 %s4286_s28, 4  ;;  %p3893_p11 = pneg %p4367_p10  ;;  %s154_s29 = int_to_ptr.vmem [resolvable:$true] %s153_s29 }
  0x10   : > { %s4205_s30 = scalar_lea.vmem %s154_s29, 16384  ;;  %p4213_p3 = scmp.lt.s32.totalorder %s154_s29, %s154_s29 }
  0x11   : > { %p3894_p12 = pnand %p3901_p9, %p3893_p11  ;;  %p4206_p0 = scmp.ne.s32.totalorder %s154_s29, %s4205_s30 }
  0x12   : > { %p4214_p4 = scmp.lt.s32.totalorder %s4205_s30, %s4205_s30 }
  0x13   : > { %p4196_p13 = pneg %p3894_p12 }
  0x14   : > { %p4215_p6 = por %p4214_p4, %p4213_p3 }
  0x15   : > { %p4208_p1 = pnand %p4206_p0, %p4196_p13 }
  0x17   : > { %p4209_p2 = pneg %p4208_p1 }
  0x19   : > { %p4216_p7 = pnand %p4215_p6, %p4209_p2 }
  0x1b   : > { %4219 = shalt.err (!%p4216_p7)
}
  0x1c   : > { %s4287_s5 = smov 256   ;;  %s4288_s6 = smov 16  }
  0x1d   : > { %3896 = dma.hbm_to_vmem [thread:$0]  (!%p3894_p12), %s5419_s2, 16384, %s154_s29, [#allocation3], %s4287_s5, %s4287_s5, %s4288_s6  }
  0x1e   : > { %181 = sbr.rel (%p4367_p10) target bundleno = 921 (0x399), region = 36 }
  0x23   : > { %4263 = dma.done.wait (%p3901_p9), [#allocation3], 16384  }
  0x24   : > { %4265 = vsyncadd (%p3901_p9), [#allocation3], 4294950912  ;;  %s3439_s9 = sshll.u32 %s4339_s19, 5  ;;  %v4289_v0 = vmov 0   ;;  %v3942_v1 = vld [vmem:[%s5418_s1 + $0x24] ss:$16 sps:$4 sm:$0xff]  }
  0x25   : > { %456 = vmatprep.mubr.bf16.mxu0 %v4289_v0  ;;  %649 = vmatprep.mubr.bf16.mxu1 %v4289_v0  ;;  %p208_p6 = scmp.lt.s32.totalorder %s3439_s9, 63  ;;  %v3944_v2 = vld [vmem:[%s5418_s1 + $0x2c] ss:$16 sps:$4 sm:$0xff]   ;;  %v3946_v3 = vld [vmem:[%s5418_s1 + $0x20] ss:$16 sps:$4 sm:$0xff]   ;;  %vm375_vm0 = vcmask 261120  }
  0x26   : > { %436 = vmatprep.subr.bf16.mxu0 %v3942_v1  ;;  %v3947_v4 = vld [vmem:[%s5418_s1 + $0x28] ss:$16 sps:$4 sm:$0xff]   ;;  %629 = vmatprep.subr.bf16.mxu1 %v3944_v2  ;;  %v3948_v5 = vld [vmem:[%s5418_s1 + $0x4] ss:$16 sps:$4 sm:$0xff]   ;;  %v3950_v6 = vld [vmem:[%s5418_s1 + $0xc] ss:$16 sps:$4 sm:$0xff]  }
  0x27   : > { %s5487_s9 = smov (!%p208_p6, %s3439_s9), 63  ;;  %437 = vmatpush1.bf16.msra.mxu0 %v3946_v3  ;;  %630 = vmatpush1.bf16.msra.mxu1 %v3947_v4  ;;  %v3952_v7 = vld [vmem:[%s5418_s1] ss:$16 sps:$4 sm:$0xff]   ;;  %v3953_v8 = vld [vmem:[%s5418_s1 + $0x8] ss:$16 sps:$4 sm:$0xff]   ;;  %s3662_s12 = sshll.u32 %s4339_s19, 12 }
  0x28   : > { %s3440_s14 = sshll.u32 %s5487_s9, 2  ;;  %438 = vmatprep.subr.bf16.mxu0 %v3948_v5  ;;  %631 = vmatprep.subr.bf16.mxu1 %v3950_v6  ;;  %v3966_v11 = vld [vmem:[#allocation2 + $0xe4] ss:$16 sps:$4 sm:$0xff]   ;;  %v3964_v12 = vld [vmem:[#allocation2 + $0xe0] ss:$16 sps:$4 sm:$0xff]   ;;  %s204_s9 = sand.u32 1, %s4276_s16  }
  0x29   : > { %s4411_s10 = scalar_lea.vmem %s5417_s0, %s3440_s14  ;;  %v3969_v13 = vld [vmem:[#allocation2 + $0x2e4] ss:$16 sps:$4 sm:$0xff]   ;;  %v3967_v14 = vld [vmem:[#allocation2 + $0x2e0] ss:$16 sps:$4 sm:$0xff]   ;;  %s5370_s22 = scalar_lea.hbm %s5421_s4, %s3662_s12 }
  0x2a   : > { %v3954_v9 = vld [vmem:[%s4411_s10] sm:$0xff]   ;;  %v3955_v10 = vld [vmem:[%s4411_s10 + $0x8] sm:$0xff]   ;;  %v3956_v19 = vld [vmem:[%s4411_s10 + $0x10] sm:$0xff]   ;;  %s5377_s23 = scalar_lea.sflag [#allocation4], %s204_s9  ;;  %s4290_s27 = smov [#allocation5]  }
  0x2b   : > { %439 = vmatpush1.bf16.msra.mxu0 %v3952_v7  ;;  %632 = vmatpush1.bf16.msra.mxu1 %v3953_v8  ;;  %v3973_v15 = vld [vmem:[#allocation2 + $0xc4] ss:$16 sps:$4 sm:$0xff]   ;;  %v3971_v16 = vld [vmem:[#allocation2 + $0xc0] ss:$16 sps:$4 sm:$0xff]   ;;  %v3957_v26 = vld [vmem:[%s4411_s10 + $0x18] sm:$0xff]   ;;  %s4224_s28 = sshll.u32 %s4290_s27, 4  ;;  %s4225_s28 = int_to_ptr.vmem [resolvable:$false] %s4224_s28 }
  0x2c   : > { %1770 = vmatprep.subr.bf16.mxu0 %v3966_v11  ;;  %1963 = vmatprep.subr.bf16.mxu1 %v3969_v13  ;;  %v3976_v17 = vld [vmem:[#allocation2 + $0x2c4] ss:$16 sps:$4 sm:$0xff]   ;;  %v3974_v18 = vld [vmem:[#allocation2 + $0x2c0] ss:$16 sps:$4 sm:$0xff]   ;;  %v3959_v47 = vld [vmem:[%s4411_s10 + $0x28] sm:$0xff]   ;;  %s4226_s29 = scalar_lea.vmem %s4225_s28, 8192 }
  0x2d   : > { %v3980_v20 = vld [vmem:[#allocation2 + $0xa4] ss:$16 sps:$4 sm:$0xff]   ;;  %v3978_v21 = vld [vmem:[#allocation2 + $0xa0] ss:$16 sps:$4 sm:$0xff]   ;;  %v3961_v1 = vld [vmem:[%s4411_s10 + $0x38] sm:$0xff]  }
  0x2e   : > { %3465 = vmatmul.mubr.msk.bf16.vlgmr.msra.gmra.mxu0 %vm375_vm0, %v3954_v9  ;;  %3481 = vmatmul.mubr.msk.bf16.vlgmr.msra.gmra.mxu1 %vm375_vm0, %v3954_v9  ;;  %v3983_v22 = vld [vmem:[#allocation2 + $0x2a4] ss:$16 sps:$4 sm:$0xff]   ;;  %v3981_v23 = vld [vmem:[#allocation2 + $0x2a0] ss:$16 sps:$4 sm:$0xff]  }
  0x2f   : > { %466 = vmatprep.mubr.bf16.mxu0 %v4289_v0  ;;  %659 = vmatprep.mubr.bf16.mxu1 %v4289_v0  ;;  %v3987_v24 = vld [vmem:[#allocation2 + $0x84] ss:$16 sps:$4 sm:$0xff]   ;;  %v3985_v27 = vld [vmem:[#allocation2 + $0x80] ss:$16 sps:$4 sm:$0xff]  }
  0x30   : > { %1771 = vmatpush1.bf16.msra.mxu0 %v3964_v12  ;;  %1964 = vmatpush1.bf16.msra.mxu1 %v3967_v14  ;;  %v3990_v25 = vld [vmem:[#allocation2 + $0x284] ss:$16 sps:$4 sm:$0xff]   ;;  %v3988_v28 = vld [vmem:[#allocation2 + $0x280] ss:$16 sps:$4 sm:$0xff]  }
  0x31   : > { %1772 = vmatprep.subr.bf16.mxu0 %v3973_v15  ;;  %1965 = vmatprep.subr.bf16.mxu1 %v3976_v17  ;;  %v3994_v29 = vld [vmem:[#allocation2 + $0x64] ss:$16 sps:$4 sm:$0xff]   ;;  %v3992_v30 = vld [vmem:[#allocation2 + $0x60] ss:$16 sps:$4 sm:$0xff]   ;;  %v3963_v15 = vld [vmem:[%s4411_s10 + $0x48] sm:$0xff]  }
  0x32   : > { %v3997_v31 = vld [vmem:[#allocation2 + $0x264] ss:$16 sps:$4 sm:$0xff]   ;;  %v3995_v32 = vld [vmem:[#allocation2 + $0x260] ss:$16 sps:$4 sm:$0xff]  }
  0x33   : > { %v4001_v33 = vld [vmem:[#allocation2 + $0x44] ss:$16 sps:$4 sm:$0xff]   ;;  %v3999_v35 = vld [vmem:[#allocation2 + $0x40] ss:$16 sps:$4 sm:$0xff]  }
  0x34   : > { %1773 = vmatpush1.bf16.msra.mxu0 %v3971_v16  ;;  %1966 = vmatpush1.bf16.msra.mxu1 %v3974_v18  ;;  %v4004_v34 = vld [vmem:[#allocation2 + $0x244] ss:$16 sps:$4 sm:$0xff]   ;;  %v4002_v36 = vld [vmem:[#allocation2 + $0x240] ss:$16 sps:$4 sm:$0xff]  }
  0x35   : > { %1774 = vmatprep.subr.bf16.mxu0 %v3980_v20  ;;  %1967 = vmatprep.subr.bf16.mxu1 %v3983_v22  ;;  %v4008_v37 = vld [vmem:[#allocation2 + $0x24] ss:$16 sps:$4 sm:$0xff]   ;;  %v4006_v39 = vld [vmem:[#allocation2 + $0x20] ss:$16 sps:$4 sm:$0xff]   ;;  %v4071_v22 = vld [vmem:[#allocation2 + $0x2ec] ss:$16 sps:$4 sm:$0xff]  }
  0x36   : > { %3466 = vmatmul.mubr.msk.bf16.gmra.mxu0 %vm375_vm0, %v3955_v10  ;;  %3482 = vmatmul.mubr.msk.bf16.gmra.mxu1 %vm375_vm0, %v3955_v10  ;;  %v3958_v38 = vld [vmem:[%s4411_s10 + $0x20] sm:$0xff]   ;;  %v3960_v56 = vld [vmem:[%s4411_s10 + $0x30] sm:$0xff]  }
  0x37   : > { %476 = vmatprep.mubr.bf16.mxu0 %v4289_v0  ;;  %669 = vmatprep.mubr.bf16.mxu1 %v4289_v0  ;;  %v4011_v40 = vld [vmem:[#allocation2 + $0x224] ss:$16 sps:$4 sm:$0xff]   ;;  %v4009_v41 = vld [vmem:[#allocation2 + $0x220] ss:$16 sps:$4 sm:$0xff]  }
  0x38   : > { %1775 = vmatpush1.bf16.msra.mxu0 %v3978_v21  ;;  %1968 = vmatpush1.bf16.msra.mxu1 %v3981_v23  ;;  %v4014_v42 = vld [vmem:[#allocation2 + $0x4] ss:$16 sps:$4 sm:$0xff]   ;;  %v4012_v44 = vld [vmem:[#allocation2] ss:$16 sps:$4 sm:$0xff]   ;;  %v4068_v21 = vld [vmem:[#allocation2 + $0xec] ss:$16 sps:$4 sm:$0xff]  }
  0x39   : > { %1776 = vmatprep.subr.bf16.mxu0 %v3987_v24  ;;  %1969 = vmatprep.subr.bf16.mxu1 %v3990_v25  ;;  %v4017_v43 = vld [vmem:[#allocation2 + $0x204] ss:$16 sps:$4 sm:$0xff]   ;;  %v4015_v45 = vld [vmem:[#allocation2 + $0x200] ss:$16 sps:$4 sm:$0xff]   ;;  %v3977_v23 = vld [vmem:[%s4411_s10 + $0x58] sm:$0xff]  }
  0x3a   : > { %v4020_v46 = vld [vmem:[#allocation2 + $0x1e4] ss:$16 sps:$4 sm:$0xff]   ;;  %v4018_v48 = vld [vmem:[#allocation2 + $0x1e0] ss:$16 sps:$4 sm:$0xff]   ;;  %v3991_v25 = vld [vmem:[%s4411_s10 + $0x68] sm:$0xff]  }
  0x3b   : > { %v4023_v49 = vld [vmem:[#allocation2 + $0x3e4] ss:$16 sps:$4 sm:$0xff]   ;;  %v4021_v50 = vld [vmem:[#allocation2 + $0x3e0] ss:$16 sps:$4 sm:$0xff]  }
  0x3c   : > { %1777 = vmatpush1.bf16.msra.mxu0 %v3985_v27  ;;  %1970 = vmatpush1.bf16.msra.mxu1 %v3988_v28  ;;  %v4026_v51 = vld [vmem:[#allocation2 + $0x1c4] ss:$16 sps:$4 sm:$0xff]   ;;  %v4024_v53 = vld [vmem:[#allocation2 + $0x1c0] ss:$16 sps:$4 sm:$0xff]   ;;  %v4005_v27 = vld [vmem:[%s4411_s10 + $0x78] sm:$0xff]  }
  0x3d   : > { %1778 = vmatprep.subr.bf16.mxu0 %v3994_v29  ;;  %1971 = vmatprep.subr.bf16.mxu1 %v3997_v31  ;;  %v4029_v52 = vld [vmem:[#allocation2 + $0x3c4] ss:$16 sps:$4 sm:$0xff]   ;;  %v4027_v54 = vld [vmem:[#allocation2 + $0x3c0] ss:$16 sps:$4 sm:$0xff]  }
  0x3e   : > { %3467 = vmatmul.mubr.msk.bf16.gmra.mxu0 %vm375_vm0, %v3956_v19  ;;  %3483 = vmatmul.mubr.msk.bf16.gmra.mxu1 %vm375_vm0, %v3956_v19  ;;  %v4032_v55 = vld [vmem:[#allocation2 + $0x1a4] ss:$16 sps:$4 sm:$0xff]   ;;  %v4030_v57 = vld [vmem:[#allocation2 + $0x1a0] ss:$16 sps:$4 sm:$0xff]  }
  0x3f   : > { %486 = vmatprep.mubr.bf16.mxu0 %v4289_v0  ;;  %679 = vmatprep.mubr.bf16.mxu1 %v4289_v0  ;;  %v4035_v58 = vld [vmem:[#allocation2 + $0x3a4] ss:$16 sps:$4 sm:$0xff]   ;;  %v4033_v59 = vld [vmem:[#allocation2 + $0x3a0] ss:$16 sps:$4 sm:$0xff]  }
  0x40   : > { %1779 = vmatpush1.bf16.msra.mxu0 %v3992_v30  ;;  %1972 = vmatpush1.bf16.msra.mxu1 %v3995_v32  ;;  %v4038_v60 = vld [vmem:[#allocation2 + $0x184] ss:$16 sps:$4 sm:$0xff]   ;;  %v4036_v61 = vld [vmem:[#allocation2 + $0x180] ss:$16 sps:$4 sm:$0xff]  }
  0x41   : > { %1780 = vmatprep.subr.bf16.mxu0 %v4001_v33  ;;  %1973 = vmatprep.subr.bf16.mxu1 %v4004_v34  ;;  %v4041_v62 = vld [vmem:[#allocation2 + $0x384] ss:$16 sps:$4 sm:$0xff]   ;;  %v4039_v63 = vld [vmem:[#allocation2 + $0x380] ss:$16 sps:$4 sm:$0xff]  }
  0x42   : > { %v4044_v2 = vld [vmem:[#allocation2 + $0x164] ss:$16 sps:$4 sm:$0xff]   ;;  %v4042_v3 = vld [vmem:[#allocation2 + $0x160] ss:$16 sps:$4 sm:$0xff]  }
  0x43   : > { %v4047_v4 = vld [vmem:[#allocation2 + $0x364] ss:$16 sps:$4 sm:$0xff]   ;;  %v4045_v5 = vld [vmem:[#allocation2 + $0x360] ss:$16 sps:$4 sm:$0xff]  }
  0x44   : > { %1781 = vmatpush1.bf16.msra.mxu0 %v3999_v35  ;;  %1974 = vmatpush1.bf16.msra.mxu1 %v4002_v36  ;;  %v4050_v6 = vld [vmem:[#allocation2 + $0x144] ss:$16 sps:$4 sm:$0xff]   ;;  %v4048_v8 = vld [vmem:[#allocation2 + $0x140] ss:$16 sps:$4 sm:$0xff]  }
  0x45   : > { %1782 = vmatprep.subr.bf16.mxu0 %v4008_v37  ;;  %1975 = vmatprep.subr.bf16.mxu1 %v4011_v40  ;;  %v4053_v7 = vld [vmem:[#allocation2 + $0x344] ss:$16 sps:$4 sm:$0xff]   ;;  %v4051_v9 = vld [vmem:[#allocation2 + $0x340] ss:$16 sps:$4 sm:$0xff]  }
  0x46   : > { %3468 = vmatmul.mubr.msk.bf16.gmra.mxu0 %vm375_vm0, %v3957_v26  ;;  %3484 = vmatmul.mubr.msk.bf16.gmra.mxu1 %vm375_vm0, %v3957_v26  ;;  %v4056_v10 = vld [vmem:[#allocation2 + $0x124] ss:$16 sps:$4 sm:$0xff]   ;;  %v4054_v12 = vld [vmem:[#allocation2 + $0x120] ss:$16 sps:$4 sm:$0xff]  }
  0x47   : > { %496 = vmatprep.mubr.bf16.mxu0 %v4289_v0  ;;  %689 = vmatprep.mubr.bf16.mxu1 %v4289_v0  ;;  %v3962_v11 = vld [vmem:[%s4411_s10 + $0x40] sm:$0xff]   ;;  %v3970_v20 = vld [vmem:[%s4411_s10 + $0x50] sm:$0xff]  }
  0x48   : > { %1783 = vmatpush1.bf16.msra.mxu0 %v4006_v39  ;;  %1976 = vmatpush1.bf16.msra.mxu1 %v4009_v41  ;;  %v4059_v13 = vld [vmem:[#allocation2 + $0x324] ss:$16 sps:$4 sm:$0xff]   ;;  %v4057_v14 = vld [vmem:[#allocation2 + $0x320] ss:$16 sps:$4 sm:$0xff]  }
  0x49   : > { %1784 = vmatprep.subr.bf16.mxu0 %v4014_v42  ;;  %1977 = vmatprep.subr.bf16.mxu1 %v4017_v43  ;;  %v4060_v16 = vld [vmem:[#allocation2 + $0x100] ss:$16 sps:$4 sm:$0xff]   ;;  %v4062_v17 = vld [vmem:[#allocation2 + $0x104] ss:$16 sps:$4 sm:$0xff]  }
  0x4a   : > { %v4063_v18 = vld [vmem:[#allocation2 + $0x300] ss:$16 sps:$4 sm:$0xff]   ;;  %v4065_v19 = vld [vmem:[#allocation2 + $0x304] ss:$16 sps:$4 sm:$0xff]  }
  0x4b   : > { %v3984_v24 = vld [vmem:[%s4411_s10 + $0x60] sm:$0xff]   ;;  %v3998_v26 = vld [vmem:[%s4411_s10 + $0x70] sm:$0xff]   ;;  %s3438_s10 = sshll.u32 %s204_s9, 8 }
  0x4c   : > { %1785 = vmatpush1.bf16.msra.mxu0 %v4012_v44  ;;  %1978 = vmatpush1.bf16.msra.mxu1 %v4015_v45  ;;  %s5271_s11 = scalar_lea.vmem [#allocation5], %s3438_s10 }
  0x4d   : > { %1786 = vmatprep.subr.bf16.mxu0 %v4020_v46  ;;  %1979 = vmatprep.subr.bf16.mxu1 %v4023_v49  ;;  %s3358_s13 = sshll.u32 %s5271_s11, 4  ;;  %s5372_s13 = int_to_ptr.vmem [resolvable:$true] %s3358_s13 }
  0x4e   : > { %3469 = vmatmul.mubr.msk.bf16.gmra.mxu0 %vm375_vm0, %v3958_v38  ;;  %3485 = vmatmul.mubr.msk.bf16.gmra.mxu1 %vm375_vm0, %v3958_v38  ;;  %s4220_s19 = scalar_lea.vmem %s5372_s13, 4096  ;;  %p4227_p11 = scmp.lt.s32.totalorder %s5372_s13, %s4225_s28 }
  0x4f   : > { %506 = vmatprep.mubr.bf16.mxu0 %v4289_v0  ;;  %699 = vmatprep.mubr.bf16.mxu1 %v4289_v0  ;;  %p4221_p8 = scmp.ne.s32.totalorder %s5372_s13, %s4220_s19  ;;  %p4228_p12 = scmp.lt.s32.totalorder %s4226_s29, %s4220_s19 }
  0x50   : > { %1787 = vmatpush2.bf16.msra.mxu0 %v4018_v48  ;;  %1980 = vmatpush2.bf16.msra.mxu1 %v4021_v50  ;;  %v4069_v48 = vld [vmem:[#allocation2 + $0x2e8] ss:$16 sps:$4 sm:$0xff]  }
  0x51   : > { %1788 = vmatprep.subr.bf16.mxu0 %v4026_v51  ;;  %1981 = vmatprep.subr.bf16.mxu1 %v4029_v52  ;;  %p4222_p9 = pnand %p4221_p8, %p4356_p5  ;;  %p4229_p13 = por %p4228_p12, %p4227_p11 }
  0x53   : > { %p4223_p10 = pneg %p4222_p9 }
  0x54   : > { %1789 = vmatpush2.bf16.msra.mxu0 %v4024_v53  ;;  %1982 = vmatpush2.bf16.msra.mxu1 %v4027_v54  ;;  %v4074_v53 = vld [vmem:[#allocation2 + $0xcc] ss:$16 sps:$4 sm:$0xff]  }
  0x55   : > { %1790 = vmatprep.subr.bf16.mxu0 %v4032_v55  ;;  %1983 = vmatprep.subr.bf16.mxu1 %v4035_v58  ;;  %v4077_v54 = vld [vmem:[#allocation2 + $0x2cc] ss:$16 sps:$4 sm:$0xff]   ;;  %v4075_v58 = vld [vmem:[#allocation2 + $0x2c8] ss:$16 sps:$4 sm:$0xff]   ;;  %p4230_p0 = pnand %p4229_p13, %p4223_p10 }
  0x56   : > { %3470 = vmatmul.mubr.msk.bf16.gmra.mxu0 %vm375_vm0, %v3959_v47  ;;  %3486 = vmatmul.mubr.msk.bf16.gmra.mxu1 %vm375_vm0, %v3959_v47  ;;  %v4066_v47 = vld [vmem:[#allocation2 + $0xe8] ss:$16 sps:$4 sm:$0xff]  }
  0x57   : > { %516 = vmatprep.mubr.bf16.mxu0 %v4289_v0  ;;  %709 = vmatprep.mubr.bf16.mxu1 %v4289_v0 }
  0x58   : > { %1791 = vmatpush2.bf16.msra.mxu0 %v4030_v57  ;;  %1984 = vmatpush2.bf16.msra.mxu1 %v4033_v59  ;;  %v4072_v57 = vld [vmem:[#allocation2 + $0xc8] ss:$16 sps:$4 sm:$0xff]  }
  0x59   : > { %1792 = vmatprep.subr.bf16.mxu0 %v4038_v60  ;;  %1985 = vmatprep.subr.bf16.mxu1 %v4041_v62 }
  0x5c   : > { %1793 = vmatpush2.bf16.msra.mxu0 %v4036_v61  ;;  %1986 = vmatpush2.bf16.msra.mxu1 %v4039_v63  ;;  %v4080_v63 = vld [vmem:[#allocation2 + $0xac] ss:$16 sps:$4 sm:$0xff]  }
  0x5d   : > { %1794 = vmatprep.subr.bf16.mxu0 %v4044_v2  ;;  %1987 = vmatprep.subr.bf16.mxu1 %v4047_v4 }
  0x5e   : > { %3471 = vmatmul.mubr.msk.bf16.gmra.mxu0 %vm375_vm0, %v3960_v56  ;;  %3487 = vmatmul.mubr.msk.bf16.gmra.mxu1 %vm375_vm0, %v3960_v56 }
  0x5f   : > { %526 = vmatprep.mubr.bf16.mxu0 %v4289_v0  ;;  %719 = vmatprep.mubr.bf16.mxu1 %v4289_v0 }
  0x60   : > { %1795 = vmatpush2.bf16.msra.mxu0 %v4042_v3  ;;  %1988 = vmatpush2.bf16.msra.mxu1 %v4045_v5 }
  0x61   : > { %1796 = vmatprep.subr.bf16.mxu0 %v4050_v6  ;;  %1989 = vmatprep.subr.bf16.mxu1 %v4053_v7 }
  0x64   : > { %1797 = vmatpush2.bf16.msra.mxu0 %v4048_v8  ;;  %1990 = vmatpush2.bf16.msra.mxu1 %v4051_v9 }
  0x65   : > { %1798 = vmatprep.subr.bf16.mxu0 %v4056_v10  ;;  %1991 = vmatprep.subr.bf16.mxu1 %v4059_v13  ;;  %v4081_v13 = vld [vmem:[#allocation2 + $0x2a8] ss:$16 sps:$4 sm:$0xff]  }
  0x66   : > { %3472 = vmatmul.mubr.msk.bf16.gmra.mxu0 %vm375_vm0, %v3961_v1  ;;  %3488 = vmatmul.mubr.msk.bf16.gmra.mxu1 %vm375_vm0, %v3961_v1  ;;  %v4083_v1 = vld [vmem:[#allocation2 + $0x2ac] ss:$16 sps:$4 sm:$0xff]  }
  0x67   : > { %536 = vmatprep.mubr.bf16.mxu0 %v4289_v0  ;;  %729 = vmatprep.mubr.bf16.mxu1 %v4289_v0 }
  0x68   : > { %1799 = vmatpush2.bf16.msra.mxu0 %v4054_v12  ;;  %1992 = vmatpush2.bf16.msra.mxu1 %v4057_v14  ;;  %v4078_v12 = vld [vmem:[#allocation2 + $0xa8] ss:$16 sps:$4 sm:$0xff]  }
  0x69   : > { %1800 = vmatprep.subr.bf16.mxu0 %v4062_v17  ;;  %1993 = vmatprep.subr.bf16.mxu1 %v4065_v19  ;;  %v4089_v19 = vld [vmem:[#allocation2 + $0x28c] ss:$16 sps:$4 sm:$0xff]  }
  0x6c   : > { %1801 = vmatpush2.bf16.msra.mxu0 %v4060_v16  ;;  %1994 = vmatpush2.bf16.msra.mxu1 %v4063_v18  ;;  %v4086_v18 = vld [vmem:[#allocation2 + $0x8c] ss:$16 sps:$4 sm:$0xff]  }
  0x6d   : > { %2156 = vmatprep.subr.bf16.mxu0 %v4068_v21  ;;  %2349 = vmatprep.subr.bf16.mxu1 %v4071_v22  ;;  %v4084_v22 = vld [vmem:[#allocation2 + $0x88] ss:$16 sps:$4 sm:$0xff]  }
  0x6e   : > { %3473 = vmatmul.mubr.msk.bf16.gmra.mxu0 %vm375_vm0, %v3962_v11  ;;  %3489 = vmatmul.mubr.msk.bf16.gmra.mxu1 %vm375_vm0, %v3962_v11 }
  0x6f   : > { %546 = vmatprep.mubr.bf16.mxu0 %v4289_v0  ;;  %739 = vmatprep.mubr.bf16.mxu1 %v4289_v0 }
  0x76   : > { %3474 = vmatmul.mubr.msk.bf16.gmra.mxu0 %vm375_vm0, %v3963_v15  ;;  %3490 = vmatmul.mubr.msk.bf16.gmra.mxu1 %vm375_vm0, %v3963_v15 }
  0x77   : > { %556 = vmatprep.mubr.bf16.mxu0 %v4289_v0  ;;  %749 = vmatprep.mubr.bf16.mxu1 %v4289_v0 }
  0x7e   : > { %3475 = vmatmul.mubr.msk.bf16.gmra.mxu0 %vm375_vm0, %v3970_v20  ;;  %3491 = vmatmul.mubr.msk.bf16.gmra.mxu1 %vm375_vm0, %v3970_v20 }
  0x7f   : > { %566 = vmatprep.mubr.bf16.mxu0 %v4289_v0  ;;  %759 = vmatprep.mubr.bf16.mxu1 %v4289_v0 }
  0x86   : > { %3476 = vmatmul.mubr.msk.bf16.gmra.mxu0 %vm375_vm0, %v3977_v23  ;;  %3492 = vmatmul.mubr.msk.bf16.gmra.mxu1 %vm375_vm0, %v3977_v23  ;;  %v4087_v23 = vld [vmem:[#allocation2 + $0x288] ss:$16 sps:$4 sm:$0xff]  }
  0x87   : > { %576 = vmatprep.mubr.bf16.mxu0 %v4289_v0  ;;  %769 = vmatprep.mubr.bf16.mxu1 %v4289_v0 }
  0x8e   : > { %3477 = vmatmul.mubr.msk.bf16.gmra.mxu0 %vm375_vm0, %v3984_v24  ;;  %3493 = vmatmul.mubr.msk.bf16.gmra.mxu1 %vm375_vm0, %v3984_v24 }
  0x8f   : > { %586 = vmatprep.mubr.bf16.mxu0 %v4289_v0  ;;  %779 = vmatprep.mubr.bf16.mxu1 %v4289_v0 }
  0x96   : > { %3478 = vmatmul.mubr.msk.bf16.gmra.mxu0 %vm375_vm0, %v3991_v25  ;;  %3494 = vmatmul.mubr.msk.bf16.gmra.mxu1 %vm375_vm0, %v3991_v25 }
  0x97   : > { %596 = vmatprep.mubr.bf16.mxu0 %v4289_v0  ;;  %789 = vmatprep.mubr.bf16.mxu1 %v4289_v0 }
  0x9e   : > { %3479 = vmatmul.mubr.msk.bf16.gmra.mxu0 %vm375_vm0, %v3998_v26  ;;  %3495 = vmatmul.mubr.msk.bf16.gmra.mxu1 %vm375_vm0, %v3998_v26 }
  0x9f   : > { %606 = vmatprep.mubr.bf16.mxu0 %v4289_v0  ;;  %799 = vmatprep.mubr.bf16.mxu1 %v4289_v0 }
  0xa6   : > { %3480 = vmatmul.mubr.msk.bf16.gmra.mxu0 %vm375_vm0, %v4005_v27  ;;  %3496 = vmatmul.mubr.msk.bf16.gmra.mxu1 %vm375_vm0, %v4005_v27 }
  0xee   : > { %v458_v28 = vpop.f32.mrf.mxu0  ;;  %v651_v29 = vpop.f32.mrf.mxu1 }
  0xef   : > { %v810_v0 = vmax.f32 %v458_v28, 0.0  ;;  %v812_v42 = vmax.f32 %v651_v29, 0.0  ;;  %v4092_v28 = vld [vmem:[#allocation2 + $0x6c] ss:$16 sps:$4 sm:$0xff]  }
  0xf0   : > { %v460_v30 = vpop.f32.mrf.mxu0  ;;  %v653_v31 = vpop.f32.mrf.mxu1  ;;  %v4095_v29 = vld [vmem:[#allocation2 + $0x26c] ss:$16 sps:$4 sm:$0xff]  }
  0xf1   : > { %v811_v38 = vmax.f32 %v460_v30, 0.0  ;;  %v813_v39 = vmax.f32 %v653_v31, 0.0 }
  0xf2   : > { %v462_v32 = vpop.f32.mrf.mxu0  ;;  %v655_v33 = vpop.f32.mrf.mxu1 }
  0xf3   : > { %v814_v34 = vmax.f32 %v462_v32, 0.0  ;;  %v816_v35 = vmax.f32 %v655_v33, 0.0 }
  0xf4   : > { %v464_v36 = vpop.f32.mrf.mxu0  ;;  %v657_v37 = vpop.f32.mrf.mxu1 }
  0xf5   : > { %v815_v40 = vmax.f32 %v464_v36, 0.0  ;;  %v817_v41 = vmax.f32 %v657_v37, 0.0  ;;  %v4498_v49 = vpack.c.bf16 %v814_v34, %v810_v0  ;;  %v4500_v50 = vpack.c.bf16 %v816_v35, %v812_v42 }
  0xf6   : > { %v468_v43 = vpop.f32.mrf.mxu0  ;;  %v661_v44 = vpop.f32.mrf.mxu1 }
  0xf7   : > { %v4494_v45 = vpack.c.bf16 %v815_v40, %v811_v38  ;;  %v4496_v46 = vpack.c.bf16 %v817_v41, %v813_v39  ;;  %v818_v6 = vmax.f32 %v468_v43, 0.0  ;;  %v820_v7 = vmax.f32 %v661_v44, 0.0  ;;  %v4090_v40 = vld [vmem:[#allocation2 + $0x68] ss:$16 sps:$4 sm:$0xff]  }
  0xf8   : > { %v470_v51 = vpop.f32.mrf.mxu0  ;;  %v663_v52 = vpop.f32.mrf.mxu1  ;;  %v4093_v41 = vld [vmem:[#allocation2 + $0x268] ss:$16 sps:$4 sm:$0xff]  }
  0xf9   : > { %1802 = vmatprep.mubr.bf16.mxu0 %v4494_v45  ;;  %1995 = vmatprep.mubr.bf16.mxu1 %v4496_v46  ;;  %v819_v2 = vmax.f32 %v470_v51, 0.0  ;;  %v821_v3 = vmax.f32 %v663_v52, 0.0 }
  0xfa   : > { %v472_v55 = vpop.f32.mrf.mxu0  ;;  %v665_v56 = vpop.f32.mrf.mxu1  ;;  %1803 = vmatmul.mubr.bf16.vlgmr.msra.gmra.mxu0 %v4498_v49  ;;  %1996 = vmatmul.mubr.bf16.vlgmr.msra.gmra.mxu1 %v4500_v50 }
  0xfb   : > { %2157 = vmatpush1.bf16.msra.mxu0 %v4066_v47  ;;  %2350 = vmatpush1.bf16.msra.mxu1 %v4069_v48  ;;  %v822_v59 = vmax.f32 %v472_v55, 0.0  ;;  %v824_v60 = vmax.f32 %v665_v56, 0.0  ;;  %v4098_v47 = vld [vmem:[#allocation2 + $0x4c] ss:$16 sps:$4 sm:$0xff]  }
  0xfc   : > { %v474_v61 = vpop.f32.mrf.mxu0  ;;  %v667_v62 = vpop.f32.mrf.mxu1  ;;  %2158 = vmatprep.subr.bf16.mxu0 %v4074_v53  ;;  %2351 = vmatprep.subr.bf16.mxu1 %v4077_v54  ;;  %v4101_v48 = vld [vmem:[#allocation2 + $0x24c] ss:$16 sps:$4 sm:$0xff]   ;;  %v4096_v53 = vld [vmem:[#allocation2 + $0x48] ss:$16 sps:$4 sm:$0xff]  }
  0xfd   : > { %v823_v4 = vmax.f32 %v474_v61, 0.0  ;;  %v825_v5 = vmax.f32 %v667_v62, 0.0  ;;  %v4510_v14 = vpack.c.bf16 %v822_v59, %v818_v6  ;;  %v4512_v15 = vpack.c.bf16 %v824_v60, %v820_v7  ;;  %v4099_v54 = vld [vmem:[#allocation2 + $0x248] ss:$16 sps:$4 sm:$0xff]   ;;  %v4104_v59 = vld [vmem:[#allocation2 + $0x2c] ss:$16 sps:$4 sm:$0xff]  }
  0xfe   : > { %v478_v8 = vpop.f32.mrf.mxu0  ;;  %v671_v9 = vpop.f32.mrf.mxu1  ;;  %v4107_v60 = vld [vmem:[#allocation2 + $0x22c] ss:$16 sps:$4 sm:$0xff]  }
  0xff   : > { %v4506_v10 = vpack.c.bf16 %v823_v4, %v819_v2  ;;  %v4508_v11 = vpack.c.bf16 %v825_v5, %v821_v3  ;;  %2159 = vmatpush1.bf16.msra.mxu0 %v4072_v57  ;;  %2352 = vmatpush1.bf16.msra.mxu1 %v4075_v58  ;;  %v826_v34 = vmax.f32 %v478_v8, 0.0  ;;  %v828_v35 = vmax.f32 %v671_v9, 0.0  ;;  %v4102_v8 = vld [vmem:[#allocation2 + $0x28] ss:$16 sps:$4 sm:$0xff]  }
 0x100   : > { %v480_v16 = vpop.f32.mrf.mxu0  ;;  %v673_v17 = vpop.f32.mrf.mxu1  ;;  %2160 = vmatprep.subr.bf16.mxu0 %v4080_v63  ;;  %2353 = vmatprep.subr.bf16.mxu1 %v4083_v1  ;;  %v4105_v9 = vld [vmem:[#allocation2 + $0x228] ss:$16 sps:$4 sm:$0xff]  }
 0x101   : > { %1812 = vmatprep.mubr.bf16.mxu0 %v4506_v10  ;;  %2005 = vmatprep.mubr.bf16.mxu1 %v4508_v11  ;;  %v827_v30 = vmax.f32 %v480_v16, 0.0  ;;  %v829_v31 = vmax.f32 %v673_v17, 0.0 }
 0x102   : > { %v482_v20 = vpop.f32.mrf.mxu0  ;;  %v675_v21 = vpop.f32.mrf.mxu1  ;;  %1813 = vmatmul.mubr.bf16.gmra.mxu0 %v4510_v14  ;;  %2006 = vmatmul.mubr.bf16.gmra.mxu1 %v4512_v15 }
 0x103   : > { %2161 = vmatpush1.bf16.msra.mxu0 %v4078_v12  ;;  %2354 = vmatpush1.bf16.msra.mxu1 %v4081_v13  ;;  %v830_v24 = vmax.f32 %v482_v20, 0.0  ;;  %v832_v25 = vmax.f32 %v675_v21, 0.0 }
 0x104   : > { %v484_v26 = vpop.f32.mrf.mxu0  ;;  %v677_v27 = vpop.f32.mrf.mxu1  ;;  %2162 = vmatprep.subr.bf16.mxu0 %v4086_v18  ;;  %2355 = vmatprep.subr.bf16.mxu1 %v4089_v19  ;;  %v4110_v18 = vld [vmem:[#allocation2 + $0xc] ss:$16 sps:$4 sm:$0xff]  }
 0x105   : > { %v831_v32 = vmax.f32 %v484_v26, 0.0  ;;  %v833_v33 = vmax.f32 %v677_v27, 0.0  ;;  %v4522_v0 = vpack.c.bf16 %v830_v24, %v826_v34  ;;  %v4524_v42 = vpack.c.bf16 %v832_v25, %v828_v35  ;;  %v4113_v19 = vld [vmem:[#allocation2 + $0x20c] ss:$16 sps:$4 sm:$0xff]  }
 0x106   : > { %v488_v36 = vpop.f32.mrf.mxu0  ;;  %v681_v37 = vpop.f32.mrf.mxu1 }
 0x107   : > { %v4518_v38 = vpack.c.bf16 %v831_v32, %v827_v30  ;;  %v4520_v39 = vpack.c.bf16 %v833_v33, %v829_v31  ;;  %2163 = vmatpush1.bf16.msra.mxu0 %v4084_v22  ;;  %2356 = vmatpush1.bf16.msra.mxu1 %v4087_v23  ;;  %v834_v2 = vmax.f32 %v488_v36, 0.0  ;;  %v836_v3 = vmax.f32 %v681_v37, 0.0  ;;  %v4108_v22 = vld [vmem:[#allocation2 + $0x8] ss:$16 sps:$4 sm:$0xff]  }
 0x108   : > { %v490_v43 = vpop.f32.mrf.mxu0  ;;  %v683_v44 = vpop.f32.mrf.mxu1  ;;  %2164 = vmatprep.subr.bf16.mxu0 %v4092_v28  ;;  %2357 = vmatprep.subr.bf16.mxu1 %v4095_v29  ;;  %v4111_v23 = vld [vmem:[#allocation2 + $0x208] ss:$16 sps:$4 sm:$0xff]   ;;  %v4116_v28 = vld [vmem:[#allocation2 + $0x1ec] ss:$16 sps:$4 sm:$0xff]  }
 0x109   : > { %1822 = vmatprep.mubr.bf16.mxu0 %v4518_v38  ;;  %2015 = vmatprep.mubr.bf16.mxu1 %v4520_v39  ;;  %v835_v61 = vmax.f32 %v490_v43, 0.0  ;;  %v837_v62 = vmax.f32 %v683_v44, 0.0  ;;  %v4119_v29 = vld [vmem:[#allocation2 + $0x3ec] ss:$16 sps:$4 sm:$0xff]   ;;  %v4114_v43 = vld [vmem:[#allocation2 + $0x1e8] ss:$16 sps:$4 sm:$0xff]  }
 0x10a   : > { %v492_v51 = vpop.f32.mrf.mxu0  ;;  %v685_v52 = vpop.f32.mrf.mxu1  ;;  %1823 = vmatmul.mubr.bf16.gmra.mxu0 %v4522_v0  ;;  %2016 = vmatmul.mubr.bf16.gmra.mxu1 %v4524_v42  ;;  %v4117_v44 = vld [vmem:[#allocation2 + $0x3e8] ss:$16 sps:$4 sm:$0xff]  }
 0x10b   : > { %2165 = vmatpush1.bf16.msra.mxu0 %v4090_v40  ;;  %2358 = vmatpush1.bf16.msra.mxu1 %v4093_v41  ;;  %v838_v55 = vmax.f32 %v492_v51, 0.0  ;;  %v840_v56 = vmax.f32 %v685_v52, 0.0 }
 0x10c   : > { %v494_v57 = vpop.f32.mrf.mxu0  ;;  %v687_v58 = vpop.f32.mrf.mxu1  ;;  %2166 = vmatprep.subr.bf16.mxu0 %v4098_v47  ;;  %2359 = vmatprep.subr.bf16.mxu1 %v4101_v48 }
 0x10d   : > { %v839_v63 = vmax.f32 %v494_v57, 0.0  ;;  %v841_v1 = vmax.f32 %v687_v58, 0.0  ;;  %v4534_v12 = vpack.c.bf16 %v838_v55, %v834_v2  ;;  %v4536_v13 = vpack.c.bf16 %v840_v56, %v836_v3  ;;  %v4120_v57 = vld [vmem:[#allocation2 + $0x1c8] ss:$16 sps:$4 sm:$0xff]  }
 0x10e   : > { %v498_v4 = vpop.f32.mrf.mxu0  ;;  %v691_v5 = vpop.f32.mrf.mxu1  ;;  %v4123_v58 = vld [vmem:[#allocation2 + $0x3c8] ss:$16 sps:$4 sm:$0xff]  }
 0x10f   : > { %v4530_v6 = vpack.c.bf16 %v839_v63, %v835_v61  ;;  %v4532_v7 = vpack.c.bf16 %v841_v1, %v837_v62  ;;  %2167 = vmatpush1.bf16.msra.mxu0 %v4096_v53  ;;  %2360 = vmatpush1.bf16.msra.mxu1 %v4099_v54  ;;  %v842_v34 = vmax.f32 %v498_v4, 0.0  ;;  %v844_v35 = vmax.f32 %v691_v5, 0.0  ;;  %v4122_v53 = vld [vmem:[#allocation2 + $0x1cc] ss:$16 sps:$4 sm:$0xff]  }
 0x110   : > { %v500_v16 = vpop.f32.mrf.mxu0  ;;  %v693_v17 = vpop.f32.mrf.mxu1  ;;  %2168 = vmatprep.subr.bf16.mxu0 %v4104_v59  ;;  %2361 = vmatprep.subr.bf16.mxu1 %v4107_v60  ;;  %v4125_v54 = vld [vmem:[#allocation2 + $0x3cc] ss:$16 sps:$4 sm:$0xff]  }
 0x111   : > { %1832 = vmatprep.mubr.bf16.mxu0 %v4530_v6  ;;  %2025 = vmatprep.mubr.bf16.mxu1 %v4532_v7  ;;  %v843_v30 = vmax.f32 %v500_v16, 0.0  ;;  %v845_v31 = vmax.f32 %v693_v17, 0.0  ;;  %v4128_v63 = vld [vmem:[#allocation2 + $0x1ac] ss:$16 sps:$4 sm:$0xff]  }
 0x112   : > { %v502_v20 = vpop.f32.mrf.mxu0  ;;  %v695_v21 = vpop.f32.mrf.mxu1  ;;  %1833 = vmatmul.mubr.bf16.gmra.mxu0 %v4534_v12  ;;  %2026 = vmatmul.mubr.bf16.gmra.mxu1 %v4536_v13  ;;  %v4131_v1 = vld [vmem:[#allocation2 + $0x3ac] ss:$16 sps:$4 sm:$0xff]  }
 0x113   : > { %2169 = vmatpush1.bf16.msra.mxu0 %v4102_v8  ;;  %2362 = vmatpush1.bf16.msra.mxu1 %v4105_v9  ;;  %v846_v24 = vmax.f32 %v502_v20, 0.0  ;;  %v848_v25 = vmax.f32 %v695_v21, 0.0  ;;  %v4126_v20 = vld [vmem:[#allocation2 + $0x1a8] ss:$16 sps:$4 sm:$0xff]  }
 0x114   : > { %v504_v26 = vpop.f32.mrf.mxu0  ;;  %v697_v27 = vpop.f32.mrf.mxu1  ;;  %2170 = vmatprep.subr.bf16.mxu0 %v4110_v18  ;;  %2363 = vmatprep.subr.bf16.mxu1 %v4113_v19  ;;  %v4129_v21 = vld [vmem:[#allocation2 + $0x3a8] ss:$16 sps:$4 sm:$0xff]  }
 0x115   : > { %v847_v32 = vmax.f32 %v504_v26, 0.0  ;;  %v849_v33 = vmax.f32 %v697_v27, 0.0  ;;  %v4546_v47 = vpack.c.bf16 %v846_v24, %v842_v34  ;;  %v4548_v48 = vpack.c.bf16 %v848_v25, %v844_v35  ;;  %v4134_v26 = vld [vmem:[#allocation2 + $0x18c] ss:$16 sps:$4 sm:$0xff]  }
 0x116   : > { %v508_v36 = vpop.f32.mrf.mxu0  ;;  %v701_v37 = vpop.f32.mrf.mxu1  ;;  %v4137_v27 = vld [vmem:[#allocation2 + $0x38c] ss:$16 sps:$4 sm:$0xff]  }
 0x117   : > { %v4542_v40 = vpack.c.bf16 %v847_v32, %v843_v30  ;;  %v4544_v41 = vpack.c.bf16 %v849_v33, %v845_v31  ;;  %2171 = vmatpush1.bf16.msra.mxu0 %v4108_v22  ;;  %2364 = vmatpush1.bf16.msra.mxu1 %v4111_v23  ;;  %v850_v8 = vmax.f32 %v508_v36, 0.0  ;;  %v852_v9 = vmax.f32 %v701_v37, 0.0  ;;  %v4132_v30 = vld [vmem:[#allocation2 + $0x188] ss:$16 sps:$4 sm:$0xff]   ;;  %v4140_v36 = vld [vmem:[#allocation2 + $0x16c] ss:$16 sps:$4 sm:$0xff]  }
 0x118   : > { %v510_v51 = vpop.f32.mrf.mxu0  ;;  %v703_v52 = vpop.f32.mrf.mxu1  ;;  %2172 = vmatprep.subr.bf16.mxu0 %v4116_v28  ;;  %2365 = vmatprep.subr.bf16.mxu1 %v4119_v29  ;;  %v4135_v31 = vld [vmem:[#allocation2 + $0x388] ss:$16 sps:$4 sm:$0xff]   ;;  %v4143_v37 = vld [vmem:[#allocation2 + $0x36c] ss:$16 sps:$4 sm:$0xff]  }
 0x119   : > { %1842 = vmatprep.mubr.bf16.mxu0 %v4542_v40  ;;  %2035 = vmatprep.mubr.bf16.mxu1 %v4544_v41  ;;  %v851_v2 = vmax.f32 %v510_v51, 0.0  ;;  %v853_v3 = vmax.f32 %v703_v52, 0.0 }
 0x11a   : > { %v512_v55 = vpop.f32.mrf.mxu0  ;;  %v705_v56 = vpop.f32.mrf.mxu1  ;;  %1843 = vmatmul.mubr.bf16.gmra.mxu0 %v4546_v47  ;;  %2036 = vmatmul.mubr.bf16.gmra.mxu1 %v4548_v48 }
 0x11b   : > { %2173 = vmatpush2.bf16.msra.mxu0 %v4114_v43  ;;  %2366 = vmatpush2.bf16.msra.mxu1 %v4117_v44  ;;  %v854_v59 = vmax.f32 %v512_v55, 0.0  ;;  %v856_v60 = vmax.f32 %v705_v56, 0.0 }
 0x11c   : > { %v514_v61 = vpop.f32.mrf.mxu0  ;;  %v707_v62 = vpop.f32.mrf.mxu1  ;;  %2174 = vmatprep.subr.bf16.mxu0 %v4122_v53  ;;  %2367 = vmatprep.subr.bf16.mxu1 %v4125_v54 }
 0x11d   : > { %v855_v4 = vmax.f32 %v514_v61, 0.0  ;;  %v857_v5 = vmax.f32 %v707_v62, 0.0  ;;  %v4558_v22 = vpack.c.bf16 %v854_v59, %v850_v8  ;;  %v4560_v23 = vpack.c.bf16 %v856_v60, %v852_v9  ;;  %v4138_v59 = vld [vmem:[#allocation2 + $0x168] ss:$16 sps:$4 sm:$0xff]  }
 0x11e   : > { %v518_v16 = vpop.f32.mrf.mxu0  ;;  %v711_v17 = vpop.f32.mrf.mxu1  ;;  %v4141_v60 = vld [vmem:[#allocation2 + $0x368] ss:$16 sps:$4 sm:$0xff]  }
 0x11f   : > { %v4554_v18 = vpack.c.bf16 %v855_v4, %v851_v2  ;;  %v4556_v19 = vpack.c.bf16 %v857_v5, %v853_v3  ;;  %2175 = vmatpush2.bf16.msra.mxu0 %v4120_v57  ;;  %2368 = vmatpush2.bf16.msra.mxu1 %v4123_v58  ;;  %v858_v53 = vmax.f32 %v518_v16, 0.0  ;;  %v860_v54 = vmax.f32 %v711_v17, 0.0  ;;  %v4146_v2 = vld [vmem:[#allocation2 + $0x14c] ss:$16 sps:$4 sm:$0xff]   ;;  %v4144_v8 = vld [vmem:[#allocation2 + $0x148] ss:$16 sps:$4 sm:$0xff]  }
 0x120   : > { %v520_v24 = vpop.f32.mrf.mxu0  ;;  %v713_v25 = vpop.f32.mrf.mxu1  ;;  %2176 = vmatprep.subr.bf16.mxu0 %v4128_v63  ;;  %2369 = vmatprep.subr.bf16.mxu1 %v4131_v1  ;;  %v4149_v3 = vld [vmem:[#allocation2 + $0x34c] ss:$16 sps:$4 sm:$0xff]   ;;  %v4147_v9 = vld [vmem:[#allocation2 + $0x348] ss:$16 sps:$4 sm:$0xff]  }
 0x121   : > { %1852 = vmatprep.mubr.bf16.mxu0 %v4554_v18  ;;  %2045 = vmatprep.mubr.bf16.mxu1 %v4556_v19  ;;  %v859_v43 = vmax.f32 %v520_v24, 0.0  ;;  %v861_v44 = vmax.f32 %v713_v25, 0.0  ;;  %v4152_v24 = vld [vmem:[#allocation2 + $0x12c] ss:$16 sps:$4 sm:$0xff]  }
 0x122   : > { %v522_v28 = vpop.f32.mrf.mxu0  ;;  %v715_v29 = vpop.f32.mrf.mxu1  ;;  %1853 = vmatmul.mubr.bf16.gmra.mxu0 %v4558_v22  ;;  %2046 = vmatmul.mubr.bf16.gmra.mxu1 %v4560_v23  ;;  %v4155_v25 = vld [vmem:[#allocation2 + $0x32c] ss:$16 sps:$4 sm:$0xff]  }
 0x123   : > { %2177 = vmatpush2.bf16.msra.mxu0 %v4126_v20  ;;  %2370 = vmatpush2.bf16.msra.mxu1 %v4129_v21  ;;  %v862_v32 = vmax.f32 %v522_v28, 0.0  ;;  %v864_v33 = vmax.f32 %v715_v29, 0.0 }
 0x124   : > { %v524_v34 = vpop.f32.mrf.mxu0  ;;  %v717_v35 = vpop.f32.mrf.mxu1  ;;  %2178 = vmatprep.subr.bf16.mxu0 %v4134_v26  ;;  %2371 = vmatprep.subr.bf16.mxu1 %v4137_v27 }
 0x125   : > { %v863_v51 = vmax.f32 %v524_v34, 0.0  ;;  %v865_v52 = vmax.f32 %v717_v35, 0.0  ;;  %v4570_v61 = vpack.c.bf16 %v862_v32, %v858_v53  ;;  %v4572_v62 = vpack.c.bf16 %v864_v33, %v860_v54  ;;  %v4158_v53 = vld [vmem:[#allocation2 + $0x10c] ss:$16 sps:$4 sm:$0xff]  }
 0x126   : > { %v528_v55 = vpop.f32.mrf.mxu0  ;;  %v721_v56 = vpop.f32.mrf.mxu1  ;;  %v4161_v54 = vld [vmem:[#allocation2 + $0x30c] ss:$16 sps:$4 sm:$0xff]  }
 0x127   : > { %v4566_v57 = vpack.c.bf16 %v863_v51, %v859_v43  ;;  %v4568_v58 = vpack.c.bf16 %v865_v52, %v861_v44  ;;  %2179 = vmatpush2.bf16.msra.mxu0 %v4132_v30  ;;  %2372 = vmatpush2.bf16.msra.mxu1 %v4135_v31  ;;  %v866_v30 = vmax.f32 %v528_v55, 0.0  ;;  %v868_v31 = vmax.f32 %v721_v56, 0.0 }
 0x128   : > { %v530_v63 = vpop.f32.mrf.mxu0  ;;  %v723_v1 = vpop.f32.mrf.mxu1  ;;  %2180 = vmatprep.subr.bf16.mxu0 %v4140_v36  ;;  %2373 = vmatprep.subr.bf16.mxu1 %v4143_v37  ;;  %v4150_v36 = vld [vmem:[#allocation2 + $0x128] ss:$16 sps:$4 sm:$0xff]  }
 0x129   : > { %1862 = vmatprep.mubr.bf16.mxu0 %v4566_v57  ;;  %2055 = vmatprep.mubr.bf16.mxu1 %v4568_v58  ;;  %v867_v26 = vmax.f32 %v530_v63, 0.0  ;;  %v869_v27 = vmax.f32 %v723_v1, 0.0  ;;  %v4153_v37 = vld [vmem:[#allocation2 + $0x328] ss:$16 sps:$4 sm:$0xff]  }
 0x12a   : > { %v532_v4 = vpop.f32.mrf.mxu0  ;;  %v725_v5 = vpop.f32.mrf.mxu1  ;;  %1863 = vmatmul.mubr.bf16.gmra.mxu0 %v4570_v61  ;;  %2056 = vmatmul.mubr.bf16.gmra.mxu1 %v4572_v62 }
 0x12b   : > { %2181 = vmatpush2.bf16.msra.mxu0 %v4138_v59  ;;  %2374 = vmatpush2.bf16.msra.mxu1 %v4141_v60  ;;  %v870_v16 = vmax.f32 %v532_v4, 0.0  ;;  %v872_v17 = vmax.f32 %v725_v5, 0.0  ;;  %v4156_v59 = vld [vmem:[#allocation2 + $0x108] ss:$16 sps:$4 sm:$0xff]  }
 0x12c   : > { %v534_v20 = vpop.f32.mrf.mxu0  ;;  %v727_v21 = vpop.f32.mrf.mxu1  ;;  %2182 = vmatprep.subr.bf16.mxu0 %v4146_v2  ;;  %2375 = vmatprep.subr.bf16.mxu1 %v4149_v3  ;;  %v4159_v60 = vld [vmem:[#allocation2 + $0x308] ss:$16 sps:$4 sm:$0xff]  }
 0x12d   : > { %v871_v28 = vmax.f32 %v534_v20, 0.0  ;;  %v873_v29 = vmax.f32 %v727_v21, 0.0  ;;  %v4582_v43 = vpack.c.bf16 %v870_v16, %v866_v30  ;;  %v4584_v44 = vpack.c.bf16 %v872_v17, %v868_v31 }
 0x12e   : > { %v538_v32 = vpop.f32.mrf.mxu0  ;;  %v731_v33 = vpop.f32.mrf.mxu1 }
 0x12f   : > { %v4578_v34 = vpack.c.bf16 %v871_v28, %v867_v26  ;;  %v4580_v35 = vpack.c.bf16 %v873_v29, %v869_v27  ;;  %2183 = vmatpush2.bf16.msra.mxu0 %v4144_v8  ;;  %2376 = vmatpush2.bf16.msra.mxu1 %v4147_v9  ;;  %v874_v16 = vmax.f32 %v538_v32, 0.0  ;;  %v876_v17 = vmax.f32 %v731_v33, 0.0 }
 0x130   : > { %v540_v51 = vpop.f32.mrf.mxu0  ;;  %v733_v52 = vpop.f32.mrf.mxu1  ;;  %2184 = vmatprep.subr.bf16.mxu0 %v4152_v24  ;;  %2377 = vmatprep.subr.bf16.mxu1 %v4155_v25 }
 0x131   : > { %1872 = vmatprep.mubr.bf16.mxu0 %v4578_v34  ;;  %2065 = vmatprep.mubr.bf16.mxu1 %v4580_v35  ;;  %v875_v4 = vmax.f32 %v540_v51, 0.0  ;;  %v877_v5 = vmax.f32 %v733_v52, 0.0 }
 0x132   : > { %v542_v55 = vpop.f32.mrf.mxu0  ;;  %v735_v56 = vpop.f32.mrf.mxu1  ;;  %1873 = vmatmul.mubr.bf16.gmra.mxu0 %v4582_v43  ;;  %2066 = vmatmul.mubr.bf16.gmra.mxu1 %v4584_v44 }
 0x133   : > { %2185 = vmatpush2.bf16.msra.mxu0 %v4150_v36  ;;  %2378 = vmatpush2.bf16.msra.mxu1 %v4153_v37  ;;  %v878_v63 = vmax.f32 %v542_v55, 0.0  ;;  %v880_v1 = vmax.f32 %v735_v56, 0.0 }
 0x134   : > { %v544_v2 = vpop.f32.mrf.mxu0  ;;  %v737_v3 = vpop.f32.mrf.mxu1  ;;  %2186 = vmatprep.subr.bf16.mxu0 %v4158_v53  ;;  %2379 = vmatprep.subr.bf16.mxu1 %v4161_v54 }
 0x135   : > { %v879_v8 = vmax.f32 %v544_v2, 0.0  ;;  %v881_v9 = vmax.f32 %v737_v3, 0.0  ;;  %v4594_v26 = vpack.c.bf16 %v878_v63, %v874_v16  ;;  %v4596_v27 = vpack.c.bf16 %v880_v1, %v876_v17 }
 0x136   : > { %v548_v20 = vpop.f32.mrf.mxu0  ;;  %v741_v21 = vpop.f32.mrf.mxu1 }
 0x137   : > { %v4590_v24 = vpack.c.bf16 %v879_v8, %v875_v4  ;;  %v4592_v25 = vpack.c.bf16 %v881_v9, %v877_v5  ;;  %2187 = vmatpush2.bf16.msra.mxu0 %v4156_v59  ;;  %2380 = vmatpush2.bf16.msra.mxu1 %v4159_v60  ;;  %v882_v55 = vmax.f32 %v548_v20, 0.0  ;;  %v884_v56 = vmax.f32 %v741_v21, 0.0 }
 0x138   : > { %v550_v28 = vpop.f32.mrf.mxu0  ;;  %v743_v29 = vpop.f32.mrf.mxu1 }
 0x139   : > { %1882 = vmatprep.mubr.bf16.mxu0 %v4590_v24  ;;  %2075 = vmatprep.mubr.bf16.mxu1 %v4592_v25  ;;  %v883_v51 = vmax.f32 %v550_v28, 0.0  ;;  %v885_v52 = vmax.f32 %v743_v29, 0.0 }
 0x13a   : > { %v552_v30 = vpop.f32.mrf.mxu0  ;;  %v745_v31 = vpop.f32.mrf.mxu1  ;;  %1883 = vmatmul.mubr.bf16.gmra.mxu0 %v4594_v26  ;;  %2076 = vmatmul.mubr.bf16.gmra.mxu1 %v4596_v27 }
 0x13b   : > { %v886_v32 = vmax.f32 %v552_v30, 0.0  ;;  %v888_v33 = vmax.f32 %v745_v31, 0.0 }
 0x13c   : > { %v554_v36 = vpop.f32.mrf.mxu0  ;;  %v747_v37 = vpop.f32.mrf.mxu1 }
 0x13d   : > { %v887_v53 = vmax.f32 %v554_v36, 0.0  ;;  %v889_v54 = vmax.f32 %v747_v37, 0.0  ;;  %v4606_v2 = vpack.c.bf16 %v886_v32, %v882_v55  ;;  %v4608_v3 = vpack.c.bf16 %v888_v33, %v884_v56 }
 0x13e   : > { %v558_v59 = vpop.f32.mrf.mxu0  ;;  %v751_v60 = vpop.f32.mrf.mxu1 }
 0x13f   : > { %v4602_v63 = vpack.c.bf16 %v887_v53, %v883_v51  ;;  %v4604_v1 = vpack.c.bf16 %v889_v54, %v885_v52  ;;  %v890_v32 = vmax.f32 %v558_v59, 0.0  ;;  %v892_v33 = vmax.f32 %v751_v60, 0.0  ;;  %v4162_v59 = vld [vmem:[%s5420_s3 + $0x78] sm:$0xff]  }
 0x140   : > { %v560_v4 = vpop.f32.mrf.mxu0  ;;  %v753_v5 = vpop.f32.mrf.mxu1  ;;  %v4163_v60 = vld [vmem:[%s5420_s3 + $0xf8] sm:$0xff]   ;;  %3663 = vmatprep.subr.bf16.mxu0 %v4162_v59 }
 0x141   : > { %1892 = vmatprep.mubr.bf16.mxu0 %v4602_v63  ;;  %2085 = vmatprep.mubr.bf16.mxu1 %v4604_v1  ;;  %v891_v28 = vmax.f32 %v560_v4, 0.0  ;;  %v893_v29 = vmax.f32 %v753_v5, 0.0 }
 0x142   : > { %v562_v8 = vpop.f32.mrf.mxu0  ;;  %v755_v9 = vpop.f32.mrf.mxu1  ;;  %1893 = vmatmul.mubr.bf16.gmra.mxu0 %v4606_v2  ;;  %2086 = vmatmul.mubr.bf16.gmra.mxu1 %v4608_v3 }
 0x143   : > { %v894_v16 = vmax.f32 %v562_v8, 0.0  ;;  %v896_v17 = vmax.f32 %v755_v9, 0.0  ;;  %3775 = vmatprep.subr.bf16.mxu1 %v4163_v60 }
 0x144   : > { %v564_v20 = vpop.f32.mrf.mxu0  ;;  %v757_v21 = vpop.f32.mrf.mxu1 }
 0x145   : > { %v895_v30 = vmax.f32 %v564_v20, 0.0  ;;  %v897_v31 = vmax.f32 %v757_v21, 0.0  ;;  %v4618_v53 = vpack.c.bf16 %v894_v16, %v890_v32  ;;  %v4620_v54 = vpack.c.bf16 %v896_v17, %v892_v33 }
 0x146   : > { %v568_v36 = vpop.f32.mrf.mxu0  ;;  %v761_v37 = vpop.f32.mrf.mxu1 }
 0x147   : > { %v4614_v51 = vpack.c.bf16 %v895_v30, %v891_v28  ;;  %v4616_v52 = vpack.c.bf16 %v897_v31, %v893_v29  ;;  %5443 = vst [vmem:[#allocation10_spill] sm:$0xff] %v4618_v53  ;;  %5444 = vst [vmem:[#allocation11_spill] sm:$0xff] %v4620_v54  ;;  %v898_v30 = vmax.f32 %v568_v36, 0.0  ;;  %v900_v31 = vmax.f32 %v761_v37, 0.0 }
 0x148   : > { %v570_v55 = vpop.f32.mrf.mxu0  ;;  %v763_v56 = vpop.f32.mrf.mxu1 }
 0x149   : > { %5441 = vst [vmem:[#allocation8_spill] sm:$0xff] %v4614_v51  ;;  %5442 = vst [vmem:[#allocation9_spill] sm:$0xff] %v4616_v52  ;;  %1902 = vmatprep.mubr.bf16.mxu0 %v4614_v51  ;;  %2095 = vmatprep.mubr.bf16.mxu1 %v4616_v52  ;;  %v899_v20 = vmax.f32 %v570_v55, 0.0  ;;  %v901_v21 = vmax.f32 %v763_v56, 0.0 }
 0x14a   : > { %v572_v4 = vpop.f32.mrf.mxu0  ;;  %v765_v5 = vpop.f32.mrf.mxu1  ;;  %1903 = vmatmul.mubr.bf16.gmra.mxu0 %v4618_v53  ;;  %2096 = vmatmul.mubr.bf16.gmra.mxu1 %v4620_v54 }
 0x14b   : > { %v902_v8 = vmax.f32 %v572_v4, 0.0  ;;  %v904_v9 = vmax.f32 %v765_v5, 0.0 }
 0x14c   : > { %v574_v16 = vpop.f32.mrf.mxu0  ;;  %v767_v17 = vpop.f32.mrf.mxu1 }
 0x14d   : > { %v903_v28 = vmax.f32 %v574_v16, 0.0  ;;  %v905_v29 = vmax.f32 %v767_v17, 0.0  ;;  %v4636_v52 = vpack.c.bf16 %v902_v8, %v898_v30  ;;  %v4638_v4 = vpack.c.bf16 %v904_v9, %v900_v31 }
 0x14e   : > { %v578_v32 = vpop.f32.mrf.mxu0  ;;  %v771_v33 = vpop.f32.mrf.mxu1 }
 0x14f   : > { %v4632_v54 = vpack.c.bf16 %v903_v28, %v899_v20  ;;  %v4634_v53 = vpack.c.bf16 %v905_v29, %v901_v21  ;;  %5446 = vst [vmem:[#allocation13_spill] sm:$0xff] %v4636_v52  ;;  %5447 = vst [vmem:[#allocation14_spill] sm:$0xff] %v4638_v4  ;;  %v906_v20 = vmax.f32 %v578_v32, 0.0  ;;  %v908_v21 = vmax.f32 %v771_v33, 0.0 }
 0x150   : > { %v580_v5 = vpop.f32.mrf.mxu0  ;;  %v773_v51 = vpop.f32.mrf.mxu1 }
 0x151   : > { %5445 = vst [vmem:[#allocation12_spill] sm:$0xff] %v4634_v53  ;;  %1912 = vmatprep.mubr.bf16.mxu0 %v4632_v54  ;;  %2105 = vmatprep.mubr.bf16.mxu1 %v4634_v53  ;;  %v907_v8 = vmax.f32 %v580_v5, 0.0  ;;  %v909_v16 = vmax.f32 %v773_v51, 0.0 }
 0x152   : > { %v582_v55 = vpop.f32.mrf.mxu0  ;;  %v775_v56 = vpop.f32.mrf.mxu1  ;;  %1913 = vmatmul.mubr.bf16.gmra.mxu0 %v4636_v52  ;;  %2106 = vmatmul.mubr.bf16.gmra.mxu1 %v4638_v4 }
 0x153   : > { %v910_v36 = vmax.f32 %v582_v55, 0.0  ;;  %v912_v37 = vmax.f32 %v775_v56, 0.0 }
 0x154   : > { %v584_v59 = vpop.f32.mrf.mxu0  ;;  %v777_v60 = vpop.f32.mrf.mxu1 }
 0x155   : > { %v911_v9 = vmax.f32 %v584_v59, 0.0  ;;  %v913_v17 = vmax.f32 %v777_v60, 0.0  ;;  %v4648_v53 = vpack.c.bf16 %v910_v36, %v906_v20  ;;  %v4650_v52 = vpack.c.bf16 %v912_v37, %v908_v21 }
 0x156   : > { %v588_v28 = vpop.f32.mrf.mxu0  ;;  %v781_v29 = vpop.f32.mrf.mxu1 }
 0x157   : > { %v4644_v30 = vpack.c.bf16 %v911_v9, %v907_v8  ;;  %v4646_v31 = vpack.c.bf16 %v913_v17, %v909_v16  ;;  %5450 = vst [vmem:[#allocation17_spill] sm:$0xff] %v4648_v53  ;;  %5451 = vst [vmem:[#allocation18_spill] sm:$0xff] %v4650_v52  ;;  %v914_v9 = vmax.f32 %v588_v28, 0.0  ;;  %v916_v17 = vmax.f32 %v781_v29, 0.0 }
 0x158   : > { %v590_v55 = vpop.f32.mrf.mxu0  ;;  %v783_v56 = vpop.f32.mrf.mxu1 }
 0x159   : > { %5448 = vst [vmem:[#allocation15_spill] sm:$0xff] %v4644_v30  ;;  %5449 = vst [vmem:[#allocation16_spill] sm:$0xff] %v4646_v31  ;;  %1922 = vmatprep.mubr.bf16.mxu0 %v4644_v30  ;;  %2115 = vmatprep.mubr.bf16.mxu1 %v4646_v31  ;;  %v915_v36 = vmax.f32 %v590_v55, 0.0  ;;  %v917_v8 = vmax.f32 %v783_v56, 0.0 }
 0x15a   : > { %v592_v51 = vpop.f32.mrf.mxu0  ;;  %v785_v5 = vpop.f32.mrf.mxu1  ;;  %1923 = vmatmul.mubr.bf16.gmra.mxu0 %v4648_v53  ;;  %2116 = vmatmul.mubr.bf16.gmra.mxu1 %v4650_v52 }
 0x15b   : > { %v918_v32 = vmax.f32 %v592_v51, 0.0  ;;  %v920_v33 = vmax.f32 %v785_v5, 0.0 }
 0x15c   : > { %v594_v59 = vpop.f32.mrf.mxu0  ;;  %v787_v60 = vpop.f32.mrf.mxu1 }
 0x15d   : > { %v919_v37 = vmax.f32 %v594_v59, 0.0  ;;  %v921_v16 = vmax.f32 %v787_v60, 0.0  ;;  %v4660_v4 = vpack.c.bf16 %v918_v32, %v914_v9  ;;  %v4662_v53 = vpack.c.bf16 %v920_v33, %v916_v17 }
 0x15e   : > { %v598_v20 = vpop.f32.mrf.mxu0  ;;  %v791_v21 = vpop.f32.mrf.mxu1 }
 0x15f   : > { %v4656_v30 = vpack.c.bf16 %v919_v37, %v915_v36  ;;  %v4658_v31 = vpack.c.bf16 %v921_v16, %v917_v8  ;;  %5454 = vst [vmem:[#allocation21_spill] sm:$0xff] %v4660_v4  ;;  %v922_v37 = vmax.f32 %v598_v20, 0.0  ;;  %v924_v16 = vmax.f32 %v791_v21, 0.0 }
 0x160   : > { %v600_v51 = vpop.f32.mrf.mxu0  ;;  %v793_v5 = vpop.f32.mrf.mxu1 }
 0x161   : > { %5452 = vst [vmem:[#allocation19_spill] sm:$0xff] %v4656_v30  ;;  %5453 = vst [vmem:[#allocation20_spill] sm:$0xff] %v4658_v31  ;;  %1932 = vmatprep.mubr.bf16.mxu0 %v4656_v30  ;;  %2125 = vmatprep.mubr.bf16.mxu1 %v4658_v31  ;;  %v923_v32 = vmax.f32 %v600_v51, 0.0  ;;  %v925_v36 = vmax.f32 %v793_v5, 0.0 }
 0x162   : > { %v602_v55 = vpop.f32.mrf.mxu0  ;;  %v795_v56 = vpop.f32.mrf.mxu1  ;;  %1933 = vmatmul.mubr.bf16.gmra.mxu0 %v4660_v4  ;;  %2126 = vmatmul.mubr.bf16.gmra.mxu1 %v4662_v53 }
 0x163   : > { %v926_v28 = vmax.f32 %v602_v55, 0.0  ;;  %v928_v29 = vmax.f32 %v795_v56, 0.0 }
 0x164   : > { %v604_v59 = vpop.f32.mrf.mxu0  ;;  %v797_v60 = vpop.f32.mrf.mxu1 }
 0x165   : > { %v927_v33 = vmax.f32 %v604_v59, 0.0  ;;  %v929_v8 = vmax.f32 %v797_v60, 0.0  ;;  %v4672_v52 = vpack.c.bf16 %v926_v28, %v922_v37  ;;  %v4674_v4 = vpack.c.bf16 %v928_v29, %v924_v16 }
 0x166   : > { %v608_v9 = vpop.f32.mrf.mxu0  ;;  %v801_v17 = vpop.f32.mrf.mxu1 }
 0x167   : > { %v4668_v30 = vpack.c.bf16 %v927_v33, %v923_v32  ;;  %v4670_v31 = vpack.c.bf16 %v929_v8, %v925_v36  ;;  %v930_v33 = vmax.f32 %v608_v9, 0.0  ;;  %v932_v8 = vmax.f32 %v801_v17, 0.0  ;;  %v4164_v9 = vld [vmem:[%s5420_s3 + $0x38] sm:$0xff]  }
 0x168   : > { %v610_v55 = vpop.f32.mrf.mxu0  ;;  %v803_v56 = vpop.f32.mrf.mxu1  ;;  %v4165_v17 = vld [vmem:[%s5420_s3 + $0xb8] sm:$0xff]  }
 0x169   : > { %5455 = vst [vmem:[#allocation22_spill] sm:$0xff] %v4668_v30  ;;  %5456 = vst [vmem:[#allocation23_spill] sm:$0xff] %v4670_v31  ;;  %1942 = vmatprep.mubr.bf16.mxu0 %v4668_v30  ;;  %2135 = vmatprep.mubr.bf16.mxu1 %v4670_v31  ;;  %v931_v28 = vmax.f32 %v610_v55, 0.0  ;;  %v933_v32 = vmax.f32 %v803_v56, 0.0  ;;  %v4166_v55 = vld [vmem:[%s5420_s3 + $0x70] sm:$0xff]  }
 0x16a   : > { %v612_v51 = vpop.f32.mrf.mxu0  ;;  %v805_v5 = vpop.f32.mrf.mxu1  ;;  %1943 = vmatmul.mubr.bf16.gmra.mxu0 %v4672_v52  ;;  %2136 = vmatmul.mubr.bf16.gmra.mxu1 %v4674_v4  ;;  %v4167_v56 = vld [vmem:[%s5420_s3 + $0xf0] sm:$0xff]  }
 0x16b   : > { %v934_v20 = vmax.f32 %v612_v51, 0.0  ;;  %v936_v21 = vmax.f32 %v805_v5, 0.0  ;;  %v4172_v51 = vld [vmem:[%s5420_s3 + $0x60] sm:$0xff]  }
 0x16c   : > { %v614_v59 = vpop.f32.mrf.mxu0  ;;  %v807_v60 = vpop.f32.mrf.mxu1  ;;  %v4184_v5 = vld [vmem:[%s5420_s3 + $0xe0] sm:$0xff]  }
 0x16d   : > { %v935_v29 = vmax.f32 %v614_v59, 0.0  ;;  %v937_v36 = vmax.f32 %v807_v60, 0.0  ;;  %v4684_v31 = vpack.c.bf16 %v934_v20, %v930_v33  ;;  %v4686_v30 = vpack.c.bf16 %v936_v21, %v932_v8  ;;  %v4173_v20 = vld [vmem:[%s5420_s3 + $0x20] sm:$0xff]   ;;  %v4187_v59 = vld [vmem:[%s5420_s3 + $0x98] sm:$0xff]   ;;  %v4179_v60 = vld [vmem:[%s5420_s3 + $0x10] sm:$0xff]  }
 0x16e   : > { %v4185_v21 = vld [vmem:[%s5420_s3 + $0xa0] sm:$0xff]  }
 0x16f   : > { %v4680_v37 = vpack.c.bf16 %v935_v29, %v931_v28  ;;  %v4682_v16 = vpack.c.bf16 %v937_v36, %v933_v32  ;;  %v5460_v32 = vld [vmem:[#allocation11_spill] sm:$0xff]  ;;  %v5461_v29 = vld [vmem:[#allocation12_spill] sm:$0xff] }
 0x171   : > { %1952 = vmatprep.mubr.bf16.mxu0 %v4680_v37  ;;  %2145 = vmatprep.mubr.bf16.mxu1 %v4682_v16 }
 0x172   : > { %1953 = vmatmul.mubr.bf16.gmra.mxu0 %v4684_v31  ;;  %2146 = vmatmul.mubr.bf16.gmra.mxu1 %v4686_v30 }
 0x173   : > { %2188 = vmatprep.mubr.bf16.mxu0 %v4494_v45  ;;  %2381 = vmatprep.mubr.bf16.mxu1 %v4496_v46  ;;  %v4168_v45 = vld [vmem:[%s5420_s3 + $0x30] sm:$0xff]  }
 0x174   : > { %v4169_v46 = vld [vmem:[%s5420_s3 + $0xb0] sm:$0xff]  }
 0x17a   : > { %2189 = vmatmul.mubr.bf16.vlgmr.msra.gmra.mxu0 %v4498_v49  ;;  %2382 = vmatmul.mubr.bf16.vlgmr.msra.gmra.mxu1 %v4500_v50  ;;  %v4170_v49 = vld [vmem:[%s5420_s3 + $0x68] sm:$0xff]  }
 0x17b   : > { %2198 = vmatprep.mubr.bf16.mxu0 %v4506_v10  ;;  %2391 = vmatprep.mubr.bf16.mxu1 %v4508_v11  ;;  %v4174_v50 = vld [vmem:[%s5420_s3 + $0xe8] sm:$0xff]  }
 0x17c   : > { %3664 = vmatpush3.bf16.msra.mxu0 %v4164_v9  ;;  %3776 = vmatpush3.bf16.msra.mxu1 %v4165_v17  ;;  %v4171_v10 = vld [vmem:[%s5420_s3 + $0x28] sm:$0xff]  }
 0x17d   : > { %3665 = vmatprep.subr.bf16.mxu0 %v4166_v55  ;;  %3777 = vmatprep.subr.bf16.mxu1 %v4167_v56  ;;  %v4175_v11 = vld [vmem:[%s5420_s3 + $0xa8] sm:$0xff]  }
 0x180   : > { %3666 = vmatpush3.bf16.msra.mxu0 %v4168_v45  ;;  %3778 = vmatpush3.bf16.msra.mxu1 %v4169_v46  ;;  %v5462_v46 = vld [vmem:[#allocation13_spill] sm:$0xff] }
 0x181   : > { %3667 = vmatprep.subr.bf16.mxu0 %v4170_v49  ;;  %3779 = vmatprep.subr.bf16.mxu1 %v4174_v50  ;;  %v5464_v49 = vld [vmem:[#allocation15_spill] sm:$0xff]  ;;  %v5465_v50 = vld [vmem:[#allocation16_spill] sm:$0xff] }
 0x182   : > { %2199 = vmatmul.mubr.bf16.gmra.mxu0 %v4510_v14  ;;  %2392 = vmatmul.mubr.bf16.gmra.mxu1 %v4512_v15  ;;  %v4176_v14 = vld [vmem:[%s5420_s3 + $0x58] sm:$0xff]  }
 0x183   : > { %2208 = vmatprep.mubr.bf16.mxu0 %v4518_v38  ;;  %2401 = vmatprep.mubr.bf16.mxu1 %v4520_v39  ;;  %v4177_v15 = vld [vmem:[%s5420_s3 + $0x18] sm:$0xff]   ;;  %v4178_v38 = vld [vmem:[%s5420_s3 + $0x50] sm:$0xff]  }
 0x184   : > { %3668 = vmatpush3.bf16.msra.mxu0 %v4171_v10  ;;  %3780 = vmatpush3.bf16.msra.mxu1 %v4175_v11  ;;  %v4186_v39 = vld [vmem:[%s5420_s3 + $0xd8] sm:$0xff]  }
 0x185   : > { %3669 = vmatprep.subr.bf16.mxu0 %v4172_v51  ;;  %3781 = vmatprep.subr.bf16.mxu1 %v4184_v5 }
 0x188   : > { %3670 = vmatpush3.bf16.msra.mxu0 %v4173_v20  ;;  %3782 = vmatpush3.bf16.msra.mxu1 %v4185_v21 }
 0x189   : > { %3671 = vmatprep.subr.bf16.mxu0 %v4176_v14  ;;  %3783 = vmatprep.subr.bf16.mxu1 %v4186_v39  ;;  %v5467_v39 = vld [vmem:[#allocation18_spill] sm:$0xff] }
 0x18a   : > { %2209 = vmatmul.mubr.bf16.gmra.mxu0 %v4522_v0  ;;  %2402 = vmatmul.mubr.bf16.gmra.mxu1 %v4524_v42  ;;  %v4180_v0 = vld [vmem:[%s5420_s3 + $0x48] sm:$0xff]  }
 0x18b   : > { %2218 = vmatprep.mubr.bf16.mxu0 %v4530_v6  ;;  %2411 = vmatprep.mubr.bf16.mxu1 %v4532_v7  ;;  %v4181_v42 = vld [vmem:[%s5420_s3 + $0x8] sm:$0xff]   ;;  %v4182_v6 = vld [vmem:[%s5420_s3 + $0x40] sm:$0xff]  }
 0x18c   : > { %3672 = vmatpush3.bf16.msra.mxu0 %v4177_v15  ;;  %3784 = vmatpush3.bf16.msra.mxu1 %v4187_v59  ;;  %v4183_v7 = vld [vmem:[%s5420_s3] sm:$0xff]   ;;  %v5468_v59 = vld [vmem:[#allocation19_spill] sm:$0xff] }
 0x18d   : > { %3673 = vmatprep.subr.bf16.mxu0 %v4178_v38  ;;  %v5466_v38 = vld [vmem:[#allocation17_spill] sm:$0xff] }
 0x190   : > { %3674 = vmatpush3.bf16.msra.mxu0 %v4179_v60  ;;  %v5469_v60 = vld [vmem:[#allocation20_spill] sm:$0xff] }
 0x191   : > { %3675 = vmatprep.subr.bf16.mxu0 %v4180_v0 }
 0x192   : > { %2219 = vmatmul.mubr.bf16.gmra.mxu0 %v4534_v12  ;;  %2412 = vmatmul.mubr.bf16.gmra.mxu1 %v4536_v13  ;;  %v4188_v12 = vld [vmem:[%s5420_s3 + $0xd0] sm:$0xff]  }
 0x193   : > { %2228 = vmatprep.mubr.bf16.mxu0 %v4542_v40  ;;  %2421 = vmatprep.mubr.bf16.mxu1 %v4544_v41  ;;  %v4189_v13 = vld [vmem:[%s5420_s3 + $0x90] sm:$0xff]   ;;  %v4190_v40 = vld [vmem:[%s5420_s3 + $0xc8] sm:$0xff]  }
 0x194   : > { %3676 = vmatpush3.bf16.msra.mxu0 %v4181_v42  ;;  %3785 = vmatprep.subr.bf16.mxu1 %v4188_v12  ;;  %v4191_v41 = vld [vmem:[%s5420_s3 + $0x88] sm:$0xff]  }
 0x195   : > { %3677 = vmatprep.subr.bf16.mxu0 %v4182_v6  ;;  %3786 = vmatpush3.bf16.msra.mxu1 %v4189_v13 }
 0x196   : > { %3787 = vmatprep.subr.bf16.mxu1 %v4190_v40 }
 0x198   : > { %3678 = vmatpush3.bf16.msra.mxu0 %v4183_v7 }
 0x199   : > { %3788 = vmatpush3.bf16.msra.mxu1 %v4191_v41 }
 0x19a   : > { %2229 = vmatmul.mubr.bf16.gmra.mxu0 %v4546_v47  ;;  %2422 = vmatmul.mubr.bf16.gmra.mxu1 %v4548_v48 }
 0x19b   : > { %2238 = vmatprep.mubr.bf16.mxu0 %v4554_v18  ;;  %2431 = vmatprep.mubr.bf16.mxu1 %v4556_v19  ;;  %v4192_v18 = vld [vmem:[%s5420_s3 + $0xc0] sm:$0xff]  }
 0x19c   : > { %v4193_v19 = vld [vmem:[%s5420_s3 + $0x80] sm:$0xff]   ;;  %3789 = vmatprep.subr.bf16.mxu1 %v4192_v18  ;;  %v5470_v18 = vld [vmem:[#allocation21_spill] sm:$0xff] }
 0x19d   : > { %3790 = vmatpush3.bf16.msra.mxu1 %v4193_v19  ;;  %v5471_v19 = vld [vmem:[#allocation22_spill] sm:$0xff] }
 0x1a2   : > { %2239 = vmatmul.mubr.bf16.gmra.mxu0 %v4558_v22  ;;  %2432 = vmatmul.mubr.bf16.gmra.mxu1 %v4560_v23 }
 0x1a3   : > { %2248 = vmatprep.mubr.bf16.mxu0 %v4566_v57  ;;  %2441 = vmatprep.mubr.bf16.mxu1 %v4568_v58 }
 0x1aa   : > { %2249 = vmatmul.mubr.bf16.gmra.mxu0 %v4570_v61  ;;  %2442 = vmatmul.mubr.bf16.gmra.mxu1 %v4572_v62 }
 0x1ab   : > { %2258 = vmatprep.mubr.bf16.mxu0 %v4578_v34  ;;  %2451 = vmatprep.mubr.bf16.mxu1 %v4580_v35 }
 0x1b2   : > { %2259 = vmatmul.mubr.bf16.gmra.mxu0 %v4582_v43  ;;  %2452 = vmatmul.mubr.bf16.gmra.mxu1 %v4584_v44  ;;  %v5457_v43 = vld [vmem:[#allocation8_spill] sm:$0xff]  ;;  %v5458_v44 = vld [vmem:[#allocation9_spill] sm:$0xff] }
 0x1b3   : > { %2268 = vmatprep.mubr.bf16.mxu0 %v4590_v24  ;;  %2461 = vmatprep.mubr.bf16.mxu1 %v4592_v25 }
 0x1ba   : > { %v4810_v47 = vpop.f32.mrf.mxu0  ;;  %v4812_v48 = vpop.f32.mrf.mxu1  ;;  %2269 = vmatmul.mubr.bf16.gmra.mxu0 %v4594_v26  ;;  %2462 = vmatmul.mubr.bf16.gmra.mxu1 %v4596_v27 }
 0x1bb   : > { %2278 = vmatprep.mubr.bf16.mxu0 %v4602_v63  ;;  %2471 = vmatprep.mubr.bf16.mxu1 %v4604_v1 }
 0x1bc   : > { %v4824_v22 = vpop.f32.mrf.mxu0  ;;  %v4826_v23 = vpop.f32.mrf.mxu1 }
 0x1be   : > { %v4828_v57 = vpop.f32.mrf.mxu0  ;;  %v4830_v58 = vpop.f32.mrf.mxu1 }
 0x1c0   : > { %v1810_v61 = vpop.f32.mrf.mxu0  ;;  %v2003_v62 = vpop.f32.mrf.mxu1 }
 0x1c2   : > { %v4832_v34 = vpop.f32.mrf.mxu0  ;;  %v4834_v35 = vpop.f32.mrf.mxu1  ;;  %2279 = vmatmul.mubr.bf16.gmra.mxu0 %v4606_v2  ;;  %2472 = vmatmul.mubr.bf16.gmra.mxu1 %v4608_v3  ;;  %v5459_v3 = vld [vmem:[#allocation10_spill] sm:$0xff] }
 0x1c3   : > { %2288 = vmatprep.mubr.bf16.mxu0 %v5457_v43  ;;  %2481 = vmatprep.mubr.bf16.mxu1 %v5458_v44  ;;  %v5472_v43 = vld [vmem:[#allocation23_spill] sm:$0xff] }
 0x1c4   : > { %v4840_v24 = vpop.f32.mrf.mxu0  ;;  %v4842_v25 = vpop.f32.mrf.mxu1 }
 0x1c6   : > { %v4844_v26 = vpop.f32.mrf.mxu0  ;;  %v4846_v27 = vpop.f32.mrf.mxu1 }
 0x1c8   : > { %v4848_v63 = vpop.f32.mrf.mxu0  ;;  %v4850_v1 = vpop.f32.mrf.mxu1 }
 0x1ca   : > { %v4852_v28 = vpop.f32.mrf.mxu0  ;;  %v4854_v2 = vpop.f32.mrf.mxu1  ;;  %2289 = vmatmul.mubr.bf16.gmra.mxu0 %v5459_v3  ;;  %2482 = vmatmul.mubr.bf16.gmra.mxu1 %v5460_v32 }
 0x1cb   : > { %2298 = vmatprep.mubr.bf16.mxu0 %v4632_v54  ;;  %2491 = vmatprep.mubr.bf16.mxu1 %v5461_v29  ;;  %v5463_v54 = vld [vmem:[#allocation14_spill] sm:$0xff] }
 0x1cc   : > { %v4860_v36 = vpop.f32.mrf.mxu0  ;;  %v4862_v33 = vpop.f32.mrf.mxu1 }
 0x1ce   : > { %v4864_v8 = vpop.f32.mrf.mxu0  ;;  %v4866_v9 = vpop.f32.mrf.mxu1 }
 0x1d0   : > { %v4868_v17 = vpop.f32.mrf.mxu0  ;;  %v4870_v55 = vpop.f32.mrf.mxu1 }
 0x1d2   : > { %v4872_v56 = vpop.f32.mrf.mxu0  ;;  %v4874_v45 = vpop.f32.mrf.mxu1  ;;  %2299 = vmatmul.mubr.bf16.gmra.mxu0 %v5462_v46  ;;  %2492 = vmatmul.mubr.bf16.gmra.mxu1 %v5463_v54 }
 0x1d3   : > { %2308 = vmatprep.mubr.bf16.mxu0 %v5464_v49  ;;  %2501 = vmatprep.mubr.bf16.mxu1 %v5465_v50  ;;  %v2004_v49 = vadd.f32 %v2003_v62, %v1810_v61 }
 0x1d4   : > { %v4880_v10 = vpop.f32.mrf.mxu0  ;;  %v4882_v11 = vpop.f32.mrf.mxu1 }
 0x1d5   : > { %v2547_v61 = vmax.f32 %v2004_v49, 0.0 }
 0x1d6   : > { %v4884_v51 = vpop.f32.mrf.mxu0  ;;  %v4886_v5 = vpop.f32.mrf.mxu1 }
 0x1d8   : > { %v4888_v20 = vpop.f32.mrf.mxu0  ;;  %v4890_v21 = vpop.f32.mrf.mxu1 }
 0x1da   : > { %v4892_v14 = vpop.f32.mrf.mxu0  ;;  %v4894_v15 = vpop.f32.mrf.mxu1  ;;  %2309 = vmatmul.mubr.bf16.gmra.mxu0 %v5466_v38  ;;  %2502 = vmatmul.mubr.bf16.gmra.mxu1 %v5467_v39  ;;  %v2000_v38 = vadd.f32 %v4826_v23, %v4824_v22  ;;  %v1998_v23 = vadd.f32 %v4812_v48, %v4810_v47 }
 0x1db   : > { %2318 = vmatprep.mubr.bf16.mxu0 %v5468_v59  ;;  %2511 = vmatprep.mubr.bf16.mxu1 %v5469_v60 }
 0x1dc   : > { %v4900_v0 = vpop.f32.mrf.mxu0  ;;  %v4902_v42 = vpop.f32.mrf.mxu1 }
 0x1de   : > { %v4904_v6 = vpop.f32.mrf.mxu0  ;;  %v4906_v7 = vpop.f32.mrf.mxu1 }
 0x1e0   : > { %v4908_v12 = vpop.f32.mrf.mxu0  ;;  %v4910_v13 = vpop.f32.mrf.mxu1 }
 0x1e2   : > { %v4912_v40 = vpop.f32.mrf.mxu0  ;;  %v4914_v41 = vpop.f32.mrf.mxu1  ;;  %2319 = vmatmul.mubr.bf16.gmra.mxu0 %v5470_v18  ;;  %2512 = vmatmul.mubr.bf16.gmra.mxu1 %v4662_v53  ;;  %v2543_v18 = vmax.f32 %v2000_v38, 0.0  ;;  %v2542_v38 = vmax.f32 %v1998_v23, 0.0 }
 0x1e3   : > { %2328 = vmatprep.mubr.bf16.mxu0 %v5471_v19  ;;  %2521 = vmatprep.mubr.bf16.mxu1 %v5472_v43 }
 0x1e4   : > { %v4920_v44 = vpop.f32.mrf.mxu0  ;;  %v4922_v3 = vpop.f32.mrf.mxu1 }
 0x1e6   : > { %v4924_v32 = vpop.f32.mrf.mxu0  ;;  %v4926_v29 = vpop.f32.mrf.mxu1 }
 0x1e8   : > { %v4928_v46 = vpop.f32.mrf.mxu0  ;;  %v4930_v54 = vpop.f32.mrf.mxu1 }
 0x1ea   : > { %v4932_v50 = vpop.f32.mrf.mxu0  ;;  %v4934_v53 = vpop.f32.mrf.mxu1  ;;  %2329 = vmatmul.mubr.bf16.gmra.mxu0 %v4672_v52  ;;  %2522 = vmatmul.mubr.bf16.gmra.mxu1 %v4674_v4  ;;  %v2002_v52 = vadd.f32 %v4830_v58, %v4828_v57  ;;  %v2010_v57 = vadd.f32 %v4842_v25, %v4840_v24  ;;  %v2024_v25 = vadd.f32 %v4870_v55, %v4868_v17 }
 0x1eb   : > { %2338 = vmatprep.mubr.bf16.mxu0 %v4680_v37  ;;  %2531 = vmatprep.mubr.bf16.mxu1 %v4682_v16  ;;  %v2014_v37 = vadd.f32 %v4850_v1, %v4848_v63  ;;  %v2671_v16 = vpack.c.bf16 %v2547_v61, %v2543_v18 }
 0x1ec   : > { %v4942_v39 = vpop.f32.mrf.mxu0  ;;  %v4944_v59 = vpop.f32.mrf.mxu1  ;;  %v2546_v58 = vmax.f32 %v2002_v52, 0.0  ;;  %v2551_v61 = vmax.f32 %v2010_v57, 0.0  ;;  %v2020_v57 = vadd.f32 %v4862_v33, %v4860_v36  ;;  %v2034_v33 = vadd.f32 %v4890_v21, %v4888_v20 }
 0x1ed   : > { %v2555_v1 = vmax.f32 %v2014_v37, 0.0  ;;  %v2008_v37 = vadd.f32 %v4834_v35, %v4832_v34 }
 0x1ee   : > { %v4946_v62 = vpop.f32.mrf.mxu0  ;;  %v4948_v60 = vpop.f32.mrf.mxu1  ;;  %v2670_v18 = vpack.c.bf16 %v2546_v58, %v2542_v38  ;;  %v2563_v38 = vmax.f32 %v2024_v25, 0.0  ;;  %v2559_v34 = vmax.f32 %v2020_v57, 0.0  ;;  %v2018_v25 = vadd.f32 %v4854_v2, %v4852_v28 }
 0x1ef   : > { %v2675_v52 = vpack.c.bf16 %v2555_v1, %v2551_v61  ;;  %v2550_v17 = vmax.f32 %v2008_v37, 0.0  ;;  %v2022_v61 = vadd.f32 %v4866_v9, %v4864_v8  ;;  %v2030_v57 = vadd.f32 %v4882_v11, %v4880_v10 }
 0x1f0   : > { %v4952_v4 = vpop.f32.mrf.mxu0  ;;  %v4954_v22 = vpop.f32.mrf.mxu1  ;;  %v2558_v20 = vmax.f32 %v2018_v25, 0.0  ;;  %v2044_v11 = vadd.f32 %v4910_v13, %v4908_v12 }
 0x1f1   : > { %v2562_v8 = vmax.f32 %v2022_v61, 0.0  ;;  %v2567_v28 = vmax.f32 %v2030_v57, 0.0  ;;  %v2040_v57 = vadd.f32 %v4902_v42, %v4900_v0  ;;  %v2054_v42 = vadd.f32 %v4930_v54, %v4928_v46 }
 0x1f2   : > { %v4960_v19 = vpop.f32.mrf.mxu0  ;;  %v4962_v43 = vpop.f32.mrf.mxu1  ;;  %2339 = vmatmul.mubr.bf16.gmra.mxu0 %v4684_v31  ;;  %2532 = vmatmul.mubr.bf16.gmra.mxu1 %v4686_v30  ;;  %v2012_v30 = vadd.f32 %v4846_v27, %v4844_v26 }
 0x1f3   : > { %3022 = vmatprep.mubr.bf16.mxu0 %v2671_v16  ;;  %v2678_v2 = vpack.c.bf16 %v2562_v8, %v2558_v20  ;;  %v2579_v20 = vmax.f32 %v2044_v11, 0.0  ;;  %v2038_v11 = vadd.f32 %v4894_v15, %v4892_v14 }
 0x1f4   : > { %v4968_v49 = vpop.f32.mrf.mxu0  ;;  %v4970_v63 = vpop.f32.mrf.mxu1  ;;  %v2554_v26 = vmax.f32 %v2012_v30, 0.0  ;;  %v2679_v30 = vpack.c.bf16 %v2563_v38, %v2559_v34  ;;  %v2032_v34 = vadd.f32 %v4886_v5, %v4884_v51 }
 0x1f5   : > { %v2574_v46 = vmax.f32 %v2038_v11, 0.0 }
 0x1f6   : > { %v4972_v47 = vpop.f32.mrf.mxu0  ;;  %v4974_v48 = vpop.f32.mrf.mxu1  ;;  %v2674_v35 = vpack.c.bf16 %v2554_v26, %v2550_v17  ;;  %v2571_v17 = vmax.f32 %v2034_v33, 0.0  ;;  %v2028_v33 = vadd.f32 %v4874_v45, %v4872_v56  ;;  %v2570_v51 = vmax.f32 %v2032_v34, 0.0 }
 0x1f7   : > { %v2575_v56 = vmax.f32 %v2040_v57, 0.0  ;;  %v2050_v57 = vadd.f32 %v4922_v3, %v4920_v44  ;;  %v2064_v3 = vadd.f32 %v4954_v22, %v4952_v4 }
 0x1f8   : > { %v4978_v31 = vpop.f32.mrf.mxu0  ;;  %v4980_v24 = vpop.f32.mrf.mxu1  ;;  %v2683_v61 = vpack.c.bf16 %v2571_v17, %v2567_v28  ;;  %v2566_v12 = vmax.f32 %v2028_v33, 0.0  ;;  %v2042_v28 = vadd.f32 %v4906_v7, %v4904_v6 }
 0x1f9   : > { %v2687_v34 = vpack.c.bf16 %v2579_v20, %v2575_v56  ;;  %v2583_v14 = vmax.f32 %v2050_v57, 0.0  ;;  %v2052_v56 = vadd.f32 %v4926_v29, %v4924_v32  ;;  %v2060_v57 = vadd.f32 %v4944_v59, %v4942_v39 }
 0x1fa   : > { %v4986_v16 = vpop.f32.mrf.mxu0  ;;  %v4988_v23 = vpop.f32.mrf.mxu1  ;;  %3023 = vmatmul.mubr.bf16.vlgmr.msra.gmra.mxu0 %v2670_v18  ;;  %v2682_v45 = vpack.c.bf16 %v2570_v51, %v2566_v12  ;;  %v2578_v6 = vmax.f32 %v2042_v28, 0.0  ;;  %v2587_v12 = vmax.f32 %v2054_v42, 0.0  ;;  %v2048_v42 = vadd.f32 %v4914_v41, %v4912_v40 }
 0x1fb   : > { %3030 = vmatprep.mubr.bf16.mxu0 %v2675_v52  ;;  %v2586_v32 = vmax.f32 %v2052_v56, 0.0  ;;  %v2591_v40 = vmax.f32 %v2060_v57, 0.0  ;;  %v2074_v59 = vadd.f32 %v4980_v24, %v4978_v31  ;;  %v2070_v57 = vadd.f32 %v4970_v63, %v4968_v49 }
 0x1fc   : > { %v4992_v27 = vpop.f32.mrf.mxu0  ;;  %v4994_v58 = vpop.f32.mrf.mxu1  ;;  %v2686_v15 = vpack.c.bf16 %v2578_v6, %v2574_v46  ;;  %v2691_v28 = vpack.c.bf16 %v2587_v12, %v2583_v14  ;;  %v2595_v46 = vmax.f32 %v2064_v3, 0.0  ;;  %v2582_v4 = vmax.f32 %v2048_v42, 0.0 }
 0x1fd   : > { %v2062_v14 = vadd.f32 %v4948_v60, %v4946_v62  ;;  %v2058_v3 = vadd.f32 %v4934_v53, %v4932_v50  ;;  %v2599_v50 = vmax.f32 %v2070_v57, 0.0  ;;  %v2080_v57 = vadd.f32 %v4994_v58, %v4992_v27 }
 0x1fe   : > { %v4996_v55 = vpop.f32.mrf.mxu0  ;;  %v4998_v1 = vpop.f32.mrf.mxu1  ;;  %v2690_v41 = vpack.c.bf16 %v2586_v32, %v2582_v4  ;;  %v2695_v56 = vpack.c.bf16 %v2595_v46, %v2591_v40  ;;  %v2603_v4 = vmax.f32 %v2074_v59, 0.0  ;;  %v2072_v40 = vadd.f32 %v4974_v48, %v4972_v47 }
 0x1ff   : > { %v2594_v62 = vmax.f32 %v2062_v14, 0.0  ;;  %v2590_v31 = vmax.f32 %v2058_v3, 0.0  ;;  %v2068_v59 = vadd.f32 %v4962_v43, %v4960_v19  ;;  %v2607_v19 = vmax.f32 %v2080_v57, 0.0 }
 0x200   : > { %v5002_v18 = vpop.f32.mrf.mxu0  ;;  %v5004_v36 = vpop.f32.mrf.mxu1  ;;  %v2699_v14 = vpack.c.bf16 %v2603_v4, %v2599_v50  ;;  %v2602_v47 = vmax.f32 %v2072_v40, 0.0  ;;  %v2082_v50 = vadd.f32 %v4998_v1, %v4996_v55 }
 0x201   : > { %v2694_v53 = vpack.c.bf16 %v2594_v62, %v2590_v31  ;;  %v2084_v63 = vadd.f32 %v5004_v36, %v5002_v18  ;;  %v2598_v18 = vmax.f32 %v2068_v59, 0.0 }
 0x202   : > { %v5010_v52 = vpop.f32.mrf.mxu0  ;;  %v5012_v37 = vpop.f32.mrf.mxu1  ;;  %3031 = vmatmul.mubr.bf16.gmra.mxu0 %v2674_v35  ;;  %v2610_v55 = vmax.f32 %v2082_v50, 0.0 }
 0x203   : > { %3038 = vmatprep.mubr.bf16.mxu0 %v2679_v30  ;;  %v2611_v31 = vmax.f32 %v2084_v63, 0.0  ;;  %v2698_v43 = vpack.c.bf16 %v2602_v47, %v2598_v18  ;;  %v2078_v63 = vadd.f32 %v4988_v23, %v4986_v16 }
 0x204   : > { %v5016_v9 = vpop.f32.mrf.mxu0  ;;  %v5018_v26 = vpop.f32.mrf.mxu1 }
 0x205   : > { %v2703_v40 = vpack.c.bf16 %v2611_v31, %v2607_v19  ;;  %v2090_v57 = vadd.f32 %v5018_v26, %v5016_v9 }
 0x206   : > { %v5020_v21 = vpop.f32.mrf.mxu0  ;;  %v5022_v38 = vpop.f32.mrf.mxu1 }
 0x207   : > { %v2615_v16 = vmax.f32 %v2090_v57, 0.0  ;;  %v2092_v19 = vadd.f32 %v5022_v38, %v5020_v21 }
 0x208   : > { %v5026_v35 = vpop.f32.mrf.mxu0  ;;  %v5028_v10 = vpop.f32.mrf.mxu1 }
 0x209   : > { %v2094_v58 = vadd.f32 %v5028_v10, %v5026_v35  ;;  %v2606_v35 = vmax.f32 %v2078_v63, 0.0 }
 0x20a   : > { %v5034_v30 = vpop.f32.mrf.mxu0  ;;  %v5036_v25 = vpop.f32.mrf.mxu1  ;;  %3039 = vmatmul.mubr.bf16.gmra.mxu0 %v2678_v2 }
 0x20b   : > { %3046 = vmatprep.mubr.bf16.mxu0 %v2683_v61  ;;  %v2619_v18 = vmax.f32 %v2094_v58, 0.0  ;;  %v2702_v23 = vpack.c.bf16 %v2610_v55, %v2606_v35  ;;  %v2088_v58 = vadd.f32 %v5012_v37, %v5010_v52  ;;  %v2618_v55 = vmax.f32 %v2092_v19, 0.0 }
 0x20c   : > { %v5040_v5 = vpop.f32.mrf.mxu0  ;;  %v5042_v8 = vpop.f32.mrf.mxu1 }
 0x20d   : > { %v2707_v50 = vpack.c.bf16 %v2619_v18, %v2615_v16  ;;  %v2100_v57 = vadd.f32 %v5042_v8, %v5040_v5 }
 0x20e   : > { %v5044_v13 = vpop.f32.mrf.mxu0  ;;  %v5046_v17 = vpop.f32.mrf.mxu1 }
 0x20f   : > { %v2102_v52 = vadd.f32 %v5046_v17, %v5044_v13 }
 0x210   : > { %v5050_v2 = vpop.f32.mrf.mxu0  ;;  %v5052_v0 = vpop.f32.mrf.mxu1 }
 0x211   : > { %v2104_v26 = vadd.f32 %v5052_v0, %v5050_v2  ;;  %v2626_v17 = vmax.f32 %v2102_v52, 0.0 }
 0x212   : > { %v5058_v61 = vpop.f32.mrf.mxu0  ;;  %v5060_v33 = vpop.f32.mrf.mxu1  ;;  %3047 = vmatmul.mubr.bf16.gmra.mxu0 %v2682_v45 }
 0x213   : > { %3054 = vmatprep.mubr.bf16.mxu0 %v2687_v34  ;;  %v2627_v35 = vmax.f32 %v2104_v26, 0.0  ;;  %v2098_v26 = vadd.f32 %v5036_v25, %v5034_v30 }
 0x214   : > { %v5064_v7 = vpop.f32.mrf.mxu0  ;;  %v5066_v51 = vpop.f32.mrf.mxu1 }
 0x216   : > { %v5068_v54 = vpop.f32.mrf.mxu0  ;;  %v5070_v20 = vpop.f32.mrf.mxu1 }
 0x218   : > { %v5074_v45 = vpop.f32.mrf.mxu0  ;;  %v5076_v44 = vpop.f32.mrf.mxu1 }
 0x219   : > { %v2114_v5 = vadd.f32 %v5076_v44, %v5074_v45 }
 0x21a   : > { %v5082_v34 = vpop.f32.mrf.mxu0  ;;  %v5084_v11 = vpop.f32.mrf.mxu1  ;;  %3055 = vmatmul.mubr.bf16.gmra.mxu0 %v2686_v15 }
 0x21b   : > { %3062 = vmatprep.mubr.bf16.mxu0 %v2691_v28  ;;  %v2635_v45 = vmax.f32 %v2114_v5, 0.0 }
 0x21c   : > { %v5088_v29 = vpop.f32.mrf.mxu0  ;;  %v5090_v6 = vpop.f32.mrf.mxu1 }
 0x21e   : > { %v5092_v22 = vpop.f32.mrf.mxu0  ;;  %v5094_v12 = vpop.f32.mrf.mxu1 }
 0x220   : > { %v5098_v15 = vpop.f32.mrf.mxu0  ;;  %v5100_v39 = vpop.f32.mrf.mxu1 }
 0x221   : > { %v2124_v52 = vadd.f32 %v5100_v39, %v5098_v15 }
 0x222   : > { %v5106_v28 = vpop.f32.mrf.mxu0  ;;  %v5108_v42 = vpop.f32.mrf.mxu1  ;;  %3063 = vmatmul.mubr.bf16.gmra.mxu0 %v2690_v41 }
 0x223   : > { %3070 = vmatprep.mubr.bf16.mxu0 %v2695_v56  ;;  %v2643_v15 = vmax.f32 %v2124_v52, 0.0 }
 0x224   : > { %v5112_v60 = vpop.f32.mrf.mxu0  ;;  %v5114_v32 = vpop.f32.mrf.mxu1 }
 0x226   : > { %v5116_v24 = vpop.f32.mrf.mxu0  ;;  %v5118_v46 = vpop.f32.mrf.mxu1 }
 0x228   : > { %v5122_v41 = vpop.f32.mrf.mxu0  ;;  %v5124_v49 = vpop.f32.mrf.mxu1 }
 0x22a   : > { %v5130_v56 = vpop.f32.mrf.mxu0  ;;  %v5132_v3 = vpop.f32.mrf.mxu1  ;;  %3071 = vmatmul.mubr.bf16.gmra.mxu0 %v2694_v53 }
 0x22b   : > { %3078 = vmatprep.mubr.bf16.mxu0 %v2699_v14 }
 0x22c   : > { %v5136_v48 = vpop.f32.mrf.mxu0  ;;  %v5138_v62 = vpop.f32.mrf.mxu1 }
 0x22e   : > { %v5140_v36 = vpop.f32.mrf.mxu0  ;;  %v5142_v4 = vpop.f32.mrf.mxu1 }
 0x230   : > { %v5146_v53 = vpop.f32.mrf.mxu0  ;;  %v5148_v27 = vpop.f32.mrf.mxu1 }
 0x232   : > { %v5154_v14 = vpop.f32.mrf.mxu0  ;;  %v5156_v59 = vpop.f32.mrf.mxu1  ;;  %3079 = vmatmul.mubr.bf16.gmra.mxu0 %v2698_v43 }
 0x233   : > { %5473 = vst [vmem:[#allocation8_spill] sm:$0xff] %v5154_v14  ;;  %5474 = vst [vmem:[#allocation9_spill] sm:$0xff] %v5156_v59  ;;  %3086 = vmatprep.mubr.bf16.mxu0 %v2703_v40  ;;  %v2614_v59 = vmax.f32 %v2088_v58, 0.0 }
 0x234   : > { %v5160_v1 = vpop.f32.mrf.mxu0  ;;  %v5162_v47 = vpop.f32.mrf.mxu1 }
 0x235   : > { %v2706_v18 = vpack.c.bf16 %v2618_v55, %v2614_v59 }
 0x236   : > { %v5164_v10 = vpop.f32.mrf.mxu0  ;;  %v5166_v31 = vpop.f32.mrf.mxu1 }
 0x237   : > { %5475 = vst [vmem:[#allocation10_spill] sm:$0xff] %v5164_v10  ;;  %5476 = vst [vmem:[#allocation11_spill] sm:$0xff] %v5166_v31  ;;  %v2623_v10 = vmax.f32 %v2100_v57, 0.0 }
 0x238   : > { %v5170_v43 = vpop.f32.mrf.mxu0  ;;  %v5172_v9 = vpop.f32.mrf.mxu1 }
 0x239   : > { %v2711_v19 = vpack.c.bf16 %v2627_v35, %v2623_v10  ;;  %v2622_v10 = vmax.f32 %v2098_v26, 0.0  ;;  %v2120_v26 = vadd.f32 %v5090_v6, %v5088_v29  ;;  %v2122_v29 = vadd.f32 %v5094_v12, %v5092_v22 }
 0x23a   : > { %v2190_v40 = vpop.f32.mrf.mxu0  ;;  %v2383_v63 = vpop.f32.mrf.mxu1  ;;  %3087 = vmatmul.mubr.bf16.gmra.mxu0 %v2702_v23 }
 0x23b   : > { %3094 = vmatprep.mubr.bf16.mxu0 %v2707_v50  ;;  %v2384_v37 = vadd.f32 %v2383_v63, %v2190_v40 }
 0x23c   : > { %v2192_v21 = vpop.f32.mrf.mxu0  ;;  %v2385_v38 = vpop.f32.mrf.mxu1 }
 0x23d   : > { %v2386_v2 = vadd.f32 %v2385_v38, %v2192_v21 }
 0x23e   : > { %v2194_v14 = vpop.f32.mrf.mxu0  ;;  %v2387_v31 = vpop.f32.mrf.mxu1 }
 0x23f   : > { %v2388_v0 = vadd.f32 %v2387_v31, %v2194_v14  ;;  %v2110_v14 = vadd.f32 %v5066_v51, %v5064_v7  ;;  %v2545_v59 = vmax.f32 %v2386_v2, 0.0  ;;  %v2544_v31 = vmax.f32 %v2384_v37, 0.0 }
 0x240   : > { %v2196_v16 = vpop.f32.mrf.mxu0  ;;  %v2389_v23 = vpop.f32.mrf.mxu1  ;;  %v2112_v7 = vadd.f32 %v5070_v20, %v5068_v54 }
 0x241   : > { %v2390_v8 = vadd.f32 %v2389_v23, %v2196_v16  ;;  %v2548_v50 = vmax.f32 %v2388_v0, 0.0  ;;  %v2631_v25 = vmax.f32 %v2110_v14, 0.0  ;;  %v2710_v0 = vpack.c.bf16 %v2626_v17, %v2622_v10 }
 0x242   : > { %v2200_v58 = vpop.f32.mrf.mxu0  ;;  %v2393_v57 = vpop.f32.mrf.mxu1  ;;  %3095 = vmatmul.mubr.bf16.gmra.mxu0 %v2706_v18  ;;  %v2108_v23 = vadd.f32 %v5060_v33, %v5058_v61  ;;  %v2639_v33 = vmax.f32 %v2120_v26, 0.0  ;;  %v2134_v10 = vadd.f32 %v5124_v49, %v5122_v41 }
 0x243   : > { %v2549_v13 = vmax.f32 %v2390_v8, 0.0  ;;  %3102 = vmatprep.mubr.bf16.mxu0 %v2711_v19  ;;  %v2672_v55 = vpack.c.bf16 %v2548_v50, %v2544_v31  ;;  %v2394_v51 = vadd.f32 %v2393_v57, %v2200_v58  ;;  %v2715_v16 = vpack.c.bf16 %v2635_v45, %v2631_v25 }
 0x244   : > { %v2202_v40 = vpop.f32.mrf.mxu0  ;;  %v2395_v63 = vpop.f32.mrf.mxu1  ;;  %v2634_v50 = vmax.f32 %v2112_v7, 0.0  ;;  %v2642_v7 = vmax.f32 %v2122_v29, 0.0  ;;  %v2651_v41 = vmax.f32 %v2134_v10, 0.0  ;;  %v2154_v10 = vadd.f32 %v5172_v9, %v5170_v43 }
 0x245   : > { %v2673_v44 = vpack.c.bf16 %v2549_v13, %v2545_v59  ;;  %v2396_v38 = vadd.f32 %v2395_v63, %v2202_v40  ;;  %v2552_v58 = vmax.f32 %v2394_v51, 0.0  ;;  %v2630_v59 = vmax.f32 %v2108_v23, 0.0 }
 0x246   : > { %v2204_v21 = vpop.f32.mrf.mxu0  ;;  %v2397_v30 = vpop.f32.mrf.mxu1  ;;  %v2667_v43 = vmax.f32 %v2154_v10, 0.0 }
 0x247   : > { %v2398_v35 = vadd.f32 %v2397_v30, %v2204_v21  ;;  %3183 = vmatprep.mubr.bf16.mxu1 %v2673_v44  ;;  %v2553_v54 = vmax.f32 %v2396_v38, 0.0  ;;  %v2714_v63 = vpack.c.bf16 %v2634_v50, %v2630_v59  ;;  %v2719_v21 = vpack.c.bf16 %v2643_v15, %v2639_v33 }
 0x248   : > { %v2206_v2 = vpop.f32.mrf.mxu0  ;;  %v2399_v18 = vpop.f32.mrf.mxu1  ;;  %3184 = vmatmul.mubr.bf16.vlgmr.msra.gmra.mxu1 %v2672_v55  ;;  %v2118_v30 = vadd.f32 %v5084_v11, %v5082_v34 }
 0x249   : > { %v2400_v37 = vadd.f32 %v2399_v18, %v2206_v2  ;;  %v2556_v5 = vmax.f32 %v2398_v35, 0.0 }
 0x24a   : > { %v2210_v8 = vpop.f32.mrf.mxu0  ;;  %v2403_v19 = vpop.f32.mrf.mxu1  ;;  %3103 = vmatmul.mubr.bf16.gmra.mxu0 %v2710_v0  ;;  %v2130_v0 = vadd.f32 %v5114_v32, %v5112_v60  ;;  %v2638_v52 = vmax.f32 %v2118_v30, 0.0  ;;  %v2132_v60 = vadd.f32 %v5118_v46, %v5116_v24  ;;  %v2138_v30 = vadd.f32 %v5132_v3, %v5130_v56 }
 0x24b   : > { %v2557_v20 = vmax.f32 %v2400_v37, 0.0  ;;  %3110 = vmatprep.mubr.bf16.mxu0 %v2715_v16  ;;  %v2676_v13 = vpack.c.bf16 %v2556_v5, %v2552_v58  ;;  %v2404_v6 = vadd.f32 %v2403_v19, %v2210_v8  ;;  %v2128_v58 = vadd.f32 %v5108_v42, %v5106_v28 }
 0x24c   : > { %v2212_v57 = vpop.f32.mrf.mxu0  ;;  %v2405_v14 = vpop.f32.mrf.mxu1  ;;  %v2647_v11 = vmax.f32 %v2130_v0, 0.0  ;;  %v2718_v8 = vpack.c.bf16 %v2642_v7, %v2638_v52  ;;  %v2650_v59 = vmax.f32 %v2132_v60, 0.0  ;;  %v2150_v0 = vadd.f32 %v5162_v47, %v5160_v1  ;;  %v5478_v1 = vld [vmem:[#allocation11_spill] sm:$0xff]  ;;  %v5479_v60 = vld [vmem:[#allocation8_spill] sm:$0xff] }
 0x24d   : > { %v2677_v39 = vpack.c.bf16 %v2557_v20, %v2553_v54  ;;  %v2406_v31 = vadd.f32 %v2405_v14, %v2212_v57  ;;  %v2560_v51 = vmax.f32 %v2404_v6, 0.0  ;;  %v2144_v54 = vadd.f32 %v5148_v27, %v5146_v53 }
 0x24e   : > { %v2214_v17 = vpop.f32.mrf.mxu0  ;;  %v2407_v61 = vpop.f32.mrf.mxu1  ;;  %v2723_v50 = vpack.c.bf16 %v2651_v41, %v2647_v11  ;;  %v2646_v33 = vmax.f32 %v2128_v58, 0.0  ;;  %v2663_v3 = vmax.f32 %v2150_v0, 0.0 }
 0x24f   : > { %v2408_v40 = vadd.f32 %v2407_v61, %v2214_v17  ;;  %3191 = vmatprep.mubr.bf16.mxu1 %v2677_v39  ;;  %v2561_v22 = vmax.f32 %v2406_v31, 0.0  ;;  %v2140_v39 = vadd.f32 %v5138_v62, %v5136_v48  ;;  %v2659_v53 = vmax.f32 %v2144_v54, 0.0 }
 0x250   : > { %v2216_v45 = vpop.f32.mrf.mxu0  ;;  %v2409_v44 = vpop.f32.mrf.mxu1  ;;  %3192 = vmatmul.mubr.bf16.gmra.mxu1 %v2676_v13  ;;  %v2722_v6 = vpack.c.bf16 %v2650_v59, %v2646_v33  ;;  %v2142_v48 = vadd.f32 %v5142_v4, %v5140_v36 }
 0x251   : > { %v2410_v55 = vadd.f32 %v2409_v44, %v2216_v45  ;;  %v2564_v25 = vmax.f32 %v2408_v40, 0.0  ;;  %v2655_v42 = vmax.f32 %v2140_v39, 0.0 }
 0x252   : > { %v2220_v38 = vpop.f32.mrf.mxu0  ;;  %v2413_v35 = vpop.f32.mrf.mxu1  ;;  %3111 = vmatmul.mubr.bf16.gmra.mxu0 %v2714_v63 }
 0x253   : > { %v2565_v12 = vmax.f32 %v2410_v55, 0.0  ;;  %3118 = vmatprep.mubr.bf16.mxu0 %v2719_v21  ;;  %v2680_v37 = vpack.c.bf16 %v2564_v25, %v2560_v51  ;;  %v2414_v32 = vadd.f32 %v2413_v35, %v2220_v38  ;;  %v2727_v21 = vpack.c.bf16 %v2659_v53, %v2655_v42 }
 0x254   : > { %v2222_v2 = vpop.f32.mrf.mxu0  ;;  %v2415_v18 = vpop.f32.mrf.mxu1 }
 0x255   : > { %v2681_v49 = vpack.c.bf16 %v2565_v12, %v2561_v22  ;;  %v2416_v23 = vadd.f32 %v2415_v18, %v2222_v2  ;;  %v2568_v13 = vmax.f32 %v2414_v32, 0.0  ;;  %v2658_v22 = vmax.f32 %v2142_v48, 0.0  ;;  %v5480_v32 = vld [vmem:[#allocation9_spill] sm:$0xff] }
 0x256   : > { %v2224_v16 = vpop.f32.mrf.mxu0  ;;  %v2417_v34 = vpop.f32.mrf.mxu1  ;;  %v2654_v2 = vmax.f32 %v2138_v30, 0.0 }
 0x257   : > { %v2418_v5 = vadd.f32 %v2417_v34, %v2224_v16  ;;  %3199 = vmatprep.mubr.bf16.mxu1 %v2681_v49  ;;  %v2569_v24 = vmax.f32 %v2416_v23, 0.0  ;;  %v5477_v16 = vld [vmem:[#allocation10_spill] sm:$0xff] }
 0x258   : > { %v2226_v19 = vpop.f32.mrf.mxu0  ;;  %v2419_v26 = vpop.f32.mrf.mxu1  ;;  %3200 = vmatmul.mubr.bf16.gmra.mxu1 %v2680_v37  ;;  %v2726_v37 = vpack.c.bf16 %v2658_v22, %v2654_v2  ;;  %v2152_v47 = vadd.f32 %v5478_v1, %v5477_v16 }
 0x259   : > { %v2420_v20 = vadd.f32 %v2419_v26, %v2226_v19  ;;  %v2572_v57 = vmax.f32 %v2418_v5, 0.0  ;;  %v2148_v19 = vadd.f32 %v5480_v32, %v5479_v60 }
 0x25a   : > { %v2230_v14 = vpop.f32.mrf.mxu0  ;;  %v2423_v15 = vpop.f32.mrf.mxu1  ;;  %3119 = vmatmul.mubr.bf16.gmra.mxu0 %v2718_v8  ;;  %v2731_v8 = vpack.c.bf16 %v2667_v43, %v2663_v3 }
 0x25b   : > { %v2573_v46 = vmax.f32 %v2420_v20, 0.0  ;;  %3126 = vmatprep.mubr.bf16.mxu0 %v2723_v50  ;;  %v2684_v31 = vpack.c.bf16 %v2572_v57, %v2568_v13  ;;  %v2424_v62 = vadd.f32 %v2423_v15, %v2230_v14  ;;  %v2666_v57 = vmax.f32 %v2152_v47, 0.0 }
 0x25c   : > { %v2232_v17 = vpop.f32.mrf.mxu0  ;;  %v2425_v61 = vpop.f32.mrf.mxu1 }
 0x25d   : > { %v2685_v27 = vpack.c.bf16 %v2573_v46, %v2569_v24  ;;  %v2426_v63 = vadd.f32 %v2425_v61, %v2232_v17  ;;  %v2576_v12 = vmax.f32 %v2424_v62, 0.0  ;;  %v2662_v46 = vmax.f32 %v2148_v19, 0.0 }
 0x25e   : > { %v2234_v40 = vpop.f32.mrf.mxu0  ;;  %v2427_v28 = vpop.f32.mrf.mxu1 }
 0x25f   : > { %v2428_v29 = vadd.f32 %v2427_v28, %v2234_v40  ;;  %3207 = vmatprep.mubr.bf16.mxu1 %v2685_v27  ;;  %v2577_v36 = vmax.f32 %v2426_v63, 0.0  ;;  %v2730_v27 = vpack.c.bf16 %v2666_v57, %v2662_v46 }
 0x260   : > { %v2236_v45 = vpop.f32.mrf.mxu0  ;;  %v2429_v44 = vpop.f32.mrf.mxu1  ;;  %3208 = vmatmul.mubr.bf16.gmra.mxu1 %v2684_v31 }
 0x261   : > { %v2430_v55 = vadd.f32 %v2429_v44, %v2236_v45  ;;  %v2580_v25 = vmax.f32 %v2428_v29, 0.0 }
 0x262   : > { %v2240_v38 = vpop.f32.mrf.mxu0  ;;  %v2433_v35 = vpop.f32.mrf.mxu1  ;;  %3127 = vmatmul.mubr.bf16.gmra.mxu0 %v2722_v6 }
 0x263   : > { %v2581_v4 = vmax.f32 %v2430_v55, 0.0  ;;  %3134 = vmatprep.mubr.bf16.mxu0 %v2727_v21  ;;  %v2688_v18 = vpack.c.bf16 %v2580_v25, %v2576_v12  ;;  %v2434_v34 = vadd.f32 %v2433_v35, %v2240_v38 }
 0x264   : > { %v2242_v7 = vpop.f32.mrf.mxu0  ;;  %v2435_v51 = vpop.f32.mrf.mxu1 }
 0x265   : > { %v2689_v9 = vpack.c.bf16 %v2581_v4, %v2577_v36  ;;  %v2436_v49 = vadd.f32 %v2435_v51, %v2242_v7  ;;  %v2584_v14 = vmax.f32 %v2434_v34, 0.0 }
 0x266   : > { %v2244_v41 = vpop.f32.mrf.mxu0  ;;  %v2437_v56 = vpop.f32.mrf.mxu1 }
 0x267   : > { %v2438_v52 = vadd.f32 %v2437_v56, %v2244_v41  ;;  %3215 = vmatprep.mubr.bf16.mxu1 %v2689_v9  ;;  %v2585_v50 = vmax.f32 %v2436_v49, 0.0 }
 0x268   : > { %v2246_v11 = vpop.f32.mrf.mxu0  ;;  %v2439_v23 = vpop.f32.mrf.mxu1  ;;  %3216 = vmatmul.mubr.bf16.gmra.mxu1 %v2688_v18 }
 0x269   : > { %v2440_v5 = vadd.f32 %v2439_v23, %v2246_v11  ;;  %v2588_v26 = vmax.f32 %v2438_v52, 0.0 }
 0x26a   : > { %v2250_v54 = vpop.f32.mrf.mxu0  ;;  %v2443_v20 = vpop.f32.mrf.mxu1  ;;  %3135 = vmatmul.mubr.bf16.gmra.mxu0 %v2726_v37 }
 0x26b   : > { %v2589_v58 = vmax.f32 %v2440_v5, 0.0  ;;  %3142 = vmatprep.mubr.bf16.mxu0 %v2731_v8  ;;  %v2692_v59 = vpack.c.bf16 %v2588_v26, %v2584_v14  ;;  %v2444_v33 = vadd.f32 %v2443_v20, %v2250_v54 }
 0x26c   : > { %v2252_v15 = vpop.f32.mrf.mxu0  ;;  %v2445_v39 = vpop.f32.mrf.mxu1 }
 0x26d   : > { %v2693_v24 = vpack.c.bf16 %v2589_v58, %v2585_v50  ;;  %v2446_v61 = vadd.f32 %v2445_v39, %v2252_v15  ;;  %v2592_v62 = vmax.f32 %v2444_v33, 0.0 }
 0x26e   : > { %v2254_v13 = vpop.f32.mrf.mxu0  ;;  %v2447_v17 = vpop.f32.mrf.mxu1 }
 0x26f   : > { %v2448_v53 = vadd.f32 %v2447_v17, %v2254_v13  ;;  %3223 = vmatprep.mubr.bf16.mxu1 %v2693_v24  ;;  %v2593_v6 = vmax.f32 %v2446_v61, 0.0 }
 0x270   : > { %v2256_v31 = vpop.f32.mrf.mxu0  ;;  %v2449_v40 = vpop.f32.mrf.mxu1  ;;  %3224 = vmatmul.mubr.bf16.gmra.mxu1 %v2692_v59 }
 0x271   : > { %v2450_v28 = vadd.f32 %v2449_v40, %v2256_v31  ;;  %v2596_v42 = vmax.f32 %v2448_v53, 0.0 }
 0x272   : > { %v2260_v63 = vpop.f32.mrf.mxu0  ;;  %v2453_v29 = vpop.f32.mrf.mxu1  ;;  %3143 = vmatmul.mubr.bf16.gmra.mxu0 %v2730_v27 }
 0x273   : > { %v2597_v48 = vmax.f32 %v2450_v28, 0.0  ;;  %v2696_v55 = vpack.c.bf16 %v2596_v42, %v2592_v62  ;;  %v2454_v35 = vadd.f32 %v2453_v29, %v2260_v63 }
 0x274   : > { %v2262_v45 = vpop.f32.mrf.mxu0  ;;  %v2455_v44 = vpop.f32.mrf.mxu1 }
 0x275   : > { %v2697_v10 = vpack.c.bf16 %v2597_v48, %v2593_v6  ;;  %v2456_v25 = vadd.f32 %v2455_v44, %v2262_v45  ;;  %v2600_v9 = vmax.f32 %v2454_v35, 0.0 }
 0x276   : > { %v2264_v21 = vpop.f32.mrf.mxu0  ;;  %v2457_v30 = vpop.f32.mrf.mxu1 }
 0x277   : > { %v2458_v38 = vadd.f32 %v2457_v30, %v2264_v21  ;;  %3231 = vmatprep.mubr.bf16.mxu1 %v2697_v10  ;;  %v2601_v51 = vmax.f32 %v2456_v25, 0.0 }
 0x278   : > { %v2266_v0 = vpop.f32.mrf.mxu0  ;;  %v2459_v36 = vpop.f32.mrf.mxu1  ;;  %3232 = vmatmul.mubr.bf16.gmra.mxu1 %v2696_v55 }
 0x279   : > { %v2460_v4 = vadd.f32 %v2459_v36, %v2266_v0  ;;  %v2604_v22 = vmax.f32 %v2458_v38, 0.0 }
 0x27a   : > { %v2270_v12 = vpop.f32.mrf.mxu0  ;;  %v2463_v7 = vpop.f32.mrf.mxu1 }
 0x27b   : > { %v2605_v43 = vmax.f32 %v2460_v4, 0.0  ;;  %v2700_v56 = vpack.c.bf16 %v2604_v22, %v2600_v9  ;;  %v2464_v16 = vadd.f32 %v2463_v7, %v2270_v12 }
 0x27c   : > { %v2272_v2 = vpop.f32.mrf.mxu0  ;;  %v2465_v18 = vpop.f32.mrf.mxu1 }
 0x27d   : > { %v2701_v41 = vpack.c.bf16 %v2605_v43, %v2601_v51  ;;  %v2466_v52 = vadd.f32 %v2465_v18, %v2272_v2  ;;  %v2608_v32 = vmax.f32 %v2464_v16, 0.0 }
 0x27e   : > { %v2274_v3 = vpop.f32.mrf.mxu0  ;;  %v2467_v49 = vpop.f32.mrf.mxu1 }
 0x27f   : > { %v2468_v37 = vadd.f32 %v2467_v49, %v2274_v3  ;;  %3239 = vmatprep.mubr.bf16.mxu1 %v2701_v41  ;;  %v2609_v8 = vmax.f32 %v2466_v52, 0.0 }
 0x280   : > { %v2276_v1 = vpop.f32.mrf.mxu0  ;;  %v2469_v47 = vpop.f32.mrf.mxu1  ;;  %3240 = vmatmul.mubr.bf16.gmra.mxu1 %v2700_v56 }
 0x281   : > { %v2470_v34 = vadd.f32 %v2469_v47, %v2276_v1  ;;  %v2612_v11 = vmax.f32 %v2468_v37, 0.0 }
 0x282   : > { %v2280_v23 = vpop.f32.mrf.mxu0  ;;  %v2473_v5 = vpop.f32.mrf.mxu1 }
 0x283   : > { %v2613_v60 = vmax.f32 %v2470_v34, 0.0  ;;  %v2704_v20 = vpack.c.bf16 %v2612_v11, %v2608_v32  ;;  %v2474_v15 = vadd.f32 %v2473_v5, %v2280_v23 }
 0x284   : > { %v2282_v19 = vpop.f32.mrf.mxu0  ;;  %v2475_v26 = vpop.f32.mrf.mxu1 }
 0x285   : > { %v2705_v54 = vpack.c.bf16 %v2613_v60, %v2609_v8  ;;  %v2476_v57 = vadd.f32 %v2475_v26, %v2282_v19  ;;  %v2616_v27 = vmax.f32 %v2474_v15, 0.0 }
 0x286   : > { %v2284_v50 = vpop.f32.mrf.mxu0  ;;  %v2477_v58 = vpop.f32.mrf.mxu1 }
 0x287   : > { %v2478_v14 = vadd.f32 %v2477_v58, %v2284_v50  ;;  %3247 = vmatprep.mubr.bf16.mxu1 %v2705_v54  ;;  %v2617_v61 = vmax.f32 %v2476_v57, 0.0 }
 0x288   : > { %v2286_v39 = vpop.f32.mrf.mxu0  ;;  %v2479_v24 = vpop.f32.mrf.mxu1  ;;  %3248 = vmatmul.mubr.bf16.gmra.mxu1 %v2704_v20 }
 0x289   : > { %v2480_v46 = vadd.f32 %v2479_v24, %v2286_v39  ;;  %v2620_v59 = vmax.f32 %v2478_v14, 0.0 }
 0x28a   : > { %v2290_v13 = vpop.f32.mrf.mxu0  ;;  %v2483_v17 = vpop.f32.mrf.mxu1 }
 0x28b   : > { %v2621_v53 = vmax.f32 %v2480_v46, 0.0  ;;  %v2708_v28 = vpack.c.bf16 %v2620_v59, %v2616_v27  ;;  %v2484_v48 = vadd.f32 %v2483_v17, %v2290_v13 }
 0x28c   : > { %v2292_v33 = vpop.f32.mrf.mxu0  ;;  %v2485_v31 = vpop.f32.mrf.mxu1 }
 0x28d   : > { %v2709_v40 = vpack.c.bf16 %v2621_v53, %v2617_v61  ;;  %v2486_v29 = vadd.f32 %v2485_v31, %v2292_v33  ;;  %v2624_v38 = vmax.f32 %v2484_v48, 0.0 }
 0x28e   : > { %v2294_v42 = vpop.f32.mrf.mxu0  ;;  %v2487_v63 = vpop.f32.mrf.mxu1 }
 0x28f   : > { %v2488_v6 = vadd.f32 %v2487_v63, %v2294_v42  ;;  %3255 = vmatprep.mubr.bf16.mxu1 %v2709_v40  ;;  %v2625_v30 = vmax.f32 %v2486_v29, 0.0 }
 0x290   : > { %v2296_v62 = vpop.f32.mrf.mxu0  ;;  %v2489_v45 = vpop.f32.mrf.mxu1  ;;  %3256 = vmatmul.mubr.bf16.gmra.mxu1 %v2708_v28 }
 0x291   : > { %v2490_v44 = vadd.f32 %v2489_v45, %v2296_v62  ;;  %v2628_v10 = vmax.f32 %v2488_v6, 0.0 }
 0x292   : > { %v2300_v55 = vpop.f32.mrf.mxu0  ;;  %v2493_v21 = vpop.f32.mrf.mxu1 }
 0x293   : > { %v2629_v25 = vmax.f32 %v2490_v44, 0.0  ;;  %v2712_v4 = vpack.c.bf16 %v2628_v10, %v2624_v38  ;;  %v2494_v43 = vadd.f32 %v2493_v21, %v2300_v55 }
 0x294   : > { %v2302_v35 = vpop.f32.mrf.mxu0  ;;  %v2495_v0 = vpop.f32.mrf.mxu1 }
 0x295   : > { %v2713_v36 = vpack.c.bf16 %v2629_v25, %v2625_v30  ;;  %v2496_v7 = vadd.f32 %v2495_v0, %v2302_v35  ;;  %v2632_v37 = vmax.f32 %v2494_v43, 0.0 }
 0x296   : > { %v2304_v22 = vpop.f32.mrf.mxu0  ;;  %v2497_v12 = vpop.f32.mrf.mxu1 }
 0x297   : > { %v2498_v51 = vadd.f32 %v2497_v12, %v2304_v22  ;;  %3263 = vmatprep.mubr.bf16.mxu1 %v2713_v36  ;;  %v2633_v49 = vmax.f32 %v2496_v7, 0.0 }
 0x298   : > { %v2306_v9 = vpop.f32.mrf.mxu0  ;;  %v2499_v2 = vpop.f32.mrf.mxu1  ;;  %3264 = vmatmul.mubr.bf16.gmra.mxu1 %v2712_v4 }
 0x299   : > { %v2500_v18 = vadd.f32 %v2499_v2, %v2306_v9  ;;  %v2636_v41 = vmax.f32 %v2498_v51, 0.0 }
 0x29a   : > { %v2310_v56 = vpop.f32.mrf.mxu0  ;;  %v2503_v3 = vpop.f32.mrf.mxu1 }
 0x29b   : > { %v2637_v52 = vmax.f32 %v2500_v18, 0.0  ;;  %v2716_v34 = vpack.c.bf16 %v2636_v41, %v2632_v37  ;;  %v2504_v60 = vadd.f32 %v2503_v3, %v2310_v56 }
 0x29c   : > { %v2312_v16 = vpop.f32.mrf.mxu0  ;;  %v2505_v1 = vpop.f32.mrf.mxu1 }
 0x29d   : > { %v2717_v47 = vpack.c.bf16 %v2637_v52, %v2633_v49  ;;  %v2506_v5 = vadd.f32 %v2505_v1, %v2312_v16  ;;  %v2640_v14 = vmax.f32 %v2504_v60, 0.0 }
 0x29e   : > { %v2314_v11 = vpop.f32.mrf.mxu0  ;;  %v2507_v23 = vpop.f32.mrf.mxu1 }
 0x29f   : > { %v2508_v8 = vadd.f32 %v2507_v23, %v2314_v11  ;;  %3271 = vmatprep.mubr.bf16.mxu1 %v2717_v47  ;;  %v2641_v58 = vmax.f32 %v2506_v5, 0.0 }
 0x2a0   : > { %v2316_v32 = vpop.f32.mrf.mxu0  ;;  %v2509_v19 = vpop.f32.mrf.mxu1  ;;  %3272 = vmatmul.mubr.bf16.gmra.mxu1 %v2716_v34 }
 0x2a1   : > { %v2510_v26 = vadd.f32 %v2509_v19, %v2316_v32  ;;  %v2644_v54 = vmax.f32 %v2508_v8, 0.0 }
 0x2a2   : > { %v2320_v20 = vpop.f32.mrf.mxu0  ;;  %v2513_v50 = vpop.f32.mrf.mxu1 }
 0x2a3   : > { %v2645_v57 = vmax.f32 %v2510_v26, 0.0  ;;  %v2720_v46 = vpack.c.bf16 %v2644_v54, %v2640_v14  ;;  %v2514_v53 = vadd.f32 %v2513_v50, %v2320_v20 }
 0x2a4   : > { %v2322_v15 = vpop.f32.mrf.mxu0  ;;  %v2515_v39 = vpop.f32.mrf.mxu1 }
 0x2a5   : > { %v2721_v24 = vpack.c.bf16 %v2645_v57, %v2641_v58  ;;  %v2516_v17 = vadd.f32 %v2515_v39, %v2322_v15  ;;  %v2648_v6 = vmax.f32 %v2514_v53, 0.0 }
 0x2a6   : > { %v2324_v59 = vpop.f32.mrf.mxu0  ;;  %v2517_v13 = vpop.f32.mrf.mxu1 }
 0x2a7   : > { %v2518_v61 = vadd.f32 %v2517_v13, %v2324_v59  ;;  %3279 = vmatprep.mubr.bf16.mxu1 %v2721_v24  ;;  %v2649_v63 = vmax.f32 %v2516_v17, 0.0 }
 0x2a8   : > { %v2326_v27 = vpop.f32.mrf.mxu0  ;;  %v2519_v33 = vpop.f32.mrf.mxu1  ;;  %3280 = vmatmul.mubr.bf16.gmra.mxu1 %v2720_v46 }
 0x2a9   : > { %v2520_v31 = vadd.f32 %v2519_v33, %v2326_v27  ;;  %v2652_v40 = vmax.f32 %v2518_v61, 0.0 }
 0x2aa   : > { %v2330_v28 = vpop.f32.mrf.mxu0  ;;  %v2523_v42 = vpop.f32.mrf.mxu1 }
 0x2ab   : > { %v2653_v29 = vmax.f32 %v2520_v31, 0.0  ;;  %v2724_v44 = vpack.c.bf16 %v2652_v40, %v2648_v6  ;;  %v2524_v25 = vadd.f32 %v2523_v42, %v2330_v28 }
 0x2ac   : > { %v2332_v48 = vpop.f32.mrf.mxu0  ;;  %v2525_v62 = vpop.f32.mrf.mxu1 }
 0x2ad   : > { %v2725_v45 = vpack.c.bf16 %v2653_v29, %v2649_v63  ;;  %v2526_v21 = vadd.f32 %v2525_v62, %v2332_v48  ;;  %v2656_v51 = vmax.f32 %v2524_v25, 0.0 }
 0x2ae   : > { %v2334_v10 = vpop.f32.mrf.mxu0  ;;  %v2527_v55 = vpop.f32.mrf.mxu1 }
 0x2af   : > { %v2528_v30 = vadd.f32 %v2527_v55, %v2334_v10  ;;  %3287 = vmatprep.mubr.bf16.mxu1 %v2725_v45  ;;  %v2657_v12 = vmax.f32 %v2526_v21, 0.0 }
 0x2b0   : > { %v2336_v38 = vpop.f32.mrf.mxu0  ;;  %v2529_v35 = vpop.f32.mrf.mxu1  ;;  %3288 = vmatmul.mubr.bf16.gmra.mxu1 %v2724_v44 }
 0x2b1   : > { %v2530_v0 = vadd.f32 %v2529_v35, %v2336_v38  ;;  %v2660_v36 = vmax.f32 %v2528_v30, 0.0 }
 0x2b2   : > { %v2340_v4 = vpop.f32.mrf.mxu0  ;;  %v2533_v22 = vpop.f32.mrf.mxu1 }
 0x2b3   : > { %v2661_v7 = vmax.f32 %v2530_v0, 0.0  ;;  %v2728_v18 = vpack.c.bf16 %v2660_v36, %v2656_v51  ;;  %v2534_v52 = vadd.f32 %v2533_v22, %v2340_v4 }
 0x2b4   : > { %v2342_v43 = vpop.f32.mrf.mxu0  ;;  %v2535_v9 = vpop.f32.mrf.mxu1 }
 0x2b5   : > { %v2729_v2 = vpack.c.bf16 %v2661_v7, %v2657_v12  ;;  %v2536_v3 = vadd.f32 %v2535_v9, %v2342_v43  ;;  %v2664_v5 = vmax.f32 %v2534_v52, 0.0 }
 0x2b6   : > { %v2344_v41 = vpop.f32.mrf.mxu0  ;;  %v2537_v56 = vpop.f32.mrf.mxu1 }
 0x2b7   : > { %v2538_v49 = vadd.f32 %v2537_v56, %v2344_v41  ;;  %3295 = vmatprep.mubr.bf16.mxu1 %v2729_v2  ;;  %v2665_v11 = vmax.f32 %v2536_v3, 0.0 }
 0x2b8   : > { %v2346_v37 = vpop.f32.mrf.mxu0  ;;  %v2539_v16 = vpop.f32.mrf.mxu1  ;;  %3296 = vmatmul.mubr.bf16.gmra.mxu1 %v2728_v18 }
 0x2b9   : > { %v2540_v1 = vadd.f32 %v2539_v16, %v2346_v37  ;;  %v2668_v47 = vmax.f32 %v2538_v49, 0.0 }
 0x2ba   : > { %v3679_v34 = vpop.f32.mrf.mxu0 }
 0x2bb   : > { %v2669_v23 = vmax.f32 %v2540_v1, 0.0  ;;  %v2732_v32 = vpack.c.bf16 %v2668_v47, %v2664_v5 }
 0x2bc   : > { %v3680_v8 = vpop.f32.mrf.mxu0 }
 0x2bd   : > { %v2733_v60 = vpack.c.bf16 %v2669_v23, %v2665_v11  ;;  %v3681_v30 = vadd.f32 %v3680_v8, %v3679_v34 }
 0x2be   : > { %v3682_v19 = vpop.f32.mrf.mxu0 }
 0x2bf   : > { %3303 = vmatprep.mubr.bf16.mxu1 %v2733_v60 }
 0x2c0   : > { %v3683_v26 = vpop.f32.mrf.mxu0  ;;  %3304 = vmatmul.mubr.bf16.gmra.mxu1 %v2732_v32 }
 0x2c1   : > { %v3684_v4 = vadd.f32 %v3683_v26, %v3682_v19 }
 0x2c2   : > { %v3685_v54 = vpop.f32.mrf.mxu0 }
 0x2c4   : > { %v3686_v20 = vpop.f32.mrf.mxu0 }
 0x2c5   : > { %v3687_v9 = vadd.f32 %v3686_v20, %v3685_v54 }
 0x2c6   : > { %v3688_v50 = vpop.f32.mrf.mxu0 }
 0x2c8   : > { %v3689_v58 = vpop.f32.mrf.mxu0 }
 0x2c9   : > { %v3690_v49 = vadd.f32 %v3689_v58, %v3688_v50 }
 0x2ca   : > { %v3691_v57 = vpop.f32.mrf.mxu0 }
 0x2cc   : > { %v3692_v14 = vpop.f32.mrf.mxu0 }
 0x2cd   : > { %v3693_v34 = vadd.f32 %v3692_v14, %v3691_v57 }
 0x2ce   : > { %v3694_v15 = vpop.f32.mrf.mxu0 }
 0x2d0   : > { %v3695_v39 = vpop.f32.mrf.mxu0 }
 0x2d1   : > { %v3696_v32 = vadd.f32 %v3695_v39, %v3694_v15 }
 0x2d2   : > { %v5224_v24 = vpop.f32.mrf.mxu0 }
 0x2d4   : > { %v5226_v46 = vpop.f32.mrf.mxu0 }
 0x2d5   : > { %v3699_v58 = vadd.f32 %v5226_v46, %v5224_v24 }
 0x2d6   : > { %v5228_v59 = vpop.f32.mrf.mxu0 }
 0x2d8   : > { %v5230_v13 = vpop.f32.mrf.mxu0 }
 0x2d9   : > { %v3702_v15 = vadd.f32 %v5230_v13, %v5228_v59 }
 0x2da   : > { %v5232_v17 = vpop.f32.mrf.mxu0 }
 0x2dc   : > { %v5234_v61 = vpop.f32.mrf.mxu0 }
 0x2dd   : > { %v3705_v24 = vadd.f32 %v5234_v61, %v5232_v17 }
 0x2de   : > { %v5236_v53 = vpop.f32.mrf.mxu0 }
 0x2e0   : > { %v5238_v27 = vpop.f32.mrf.mxu0 }
 0x2e1   : > { %v3708_v59 = vadd.f32 %v5238_v27, %v5236_v53 }
 0x2e2   : > { %v5240_v33 = vpop.f32.mrf.mxu0 }
 0x2e4   : > { %v5242_v31 = vpop.f32.mrf.mxu0 }
 0x2e5   : > { %v3711_v17 = vadd.f32 %v5242_v31, %v5240_v33 }
 0x2e6   : > { %v5244_v40 = vpop.f32.mrf.mxu0 }
 0x2e8   : > { %v5246_v28 = vpop.f32.mrf.mxu0 }
 0x2e9   : > { %v3714_v53 = vadd.f32 %v5246_v28, %v5244_v40 }
 0x2ea   : > { %v5248_v42 = vpop.f32.mrf.mxu0 }
 0x2ec   : > { %v5250_v63 = vpop.f32.mrf.mxu0 }
 0x2ed   : > { %v3717_v33 = vadd.f32 %v5250_v63, %v5248_v42 }
 0x2ee   : > { %v5252_v29 = vpop.f32.mrf.mxu0 }
 0x2f0   : > { %v5254_v6 = vpop.f32.mrf.mxu0 }
 0x2f1   : > { %v3720_v40 = vadd.f32 %v5254_v6, %v5252_v29 }
 0x2f2   : > { %v5256_v48 = vpop.f32.mrf.mxu0 }
 0x2f4   : > { %v5258_v62 = vpop.f32.mrf.mxu0 }
 0x2f5   : > { %v3723_v42 = vadd.f32 %v5258_v62, %v5256_v48 }
 0x2f6   : > { %v5260_v45 = vpop.f32.mrf.mxu0 }
 0x2f8   : > { %v5262_v44 = vpop.f32.mrf.mxu0 }
 0x2f9   : > { %v3726_v29 = vadd.f32 %v5262_v44, %v5260_v45 }
 0x2fa   : > { %v5265_v10 = vpop.f32.mrf.mxu0 }
 0x2fc   : > { %v5269_v38 = vpop.f32.mrf.mxu0 }
 0x2fd   : > { %v3729_v48 = vadd.f32 %v5269_v38, %v5265_v10 }
 0x2fe   : > { %v5274_v12 = vpop.f32.mrf.mxu0 }
 0x300   : > { %v5277_v18 = vpop.f32.mrf.mxu0 }
 0x301   : > { %v3732_v45 = vadd.f32 %v5277_v18, %v5274_v12 }
 0x302   : > { %v5280_v37 = vpop.f32.mrf.mxu0 }
 0x304   : > { %v5283_v23 = vpop.f32.mrf.mxu0 }
 0x305   : > { %v3735_v10 = vadd.f32 %v5283_v23, %v5280_v37 }
 0x306   : > { %v5286_v26 = vpop.f32.mrf.mxu0 }
 0x308   : > { %v3791_v55 = vpop.f32.mrf.mxu1  ;;  %v5291_v14 = vpop.f32.mrf.mxu0 }
 0x309   : > { %v3738_v12 = vadd.f32 %v5291_v14, %v5286_v26 }
 0x30a   : > { %v3792_v21 = vpop.f32.mrf.mxu1 }
 0x30b   : > { %v3793_v25 = vadd.f32 %v3792_v21, %v3791_v55 }
 0x30c   : > { %v3794_v35 = vpop.f32.mrf.mxu1 }
 0x30d   : > { %v3186_v0 = vadd.f32 %v3793_v25, %v3681_v30  ;;  %v5296_v25 = vpop.f32.mrf.mxu0 }
 0x30e   : > { %v3795_v36 = vpop.f32.mrf.mxu1 }
 0x30f   : > { %3312 = vst [vmem:[%s5271_s11] sm:$0xff] %v3186_v0  ;;  %v3796_v22 = vadd.f32 %v3795_v36, %v3794_v35 }
 0x310   : > { %v3797_v7 = vpop.f32.mrf.mxu1 }
 0x311   : > { %v3189_v51 = vadd.f32 %v3796_v22, %v3684_v4  ;;  %v5301_v4 = vpop.f32.mrf.mxu0 }
 0x312   : > { %v3798_v43 = vpop.f32.mrf.mxu1  ;;  %v3741_v37 = vadd.f32 %v5301_v4, %v5296_v25 }
 0x313   : > { %3313 = vst [vmem:[%s5271_s11 + $0x8] sm:$0xff] %v3189_v51  ;;  %v3799_v2 = vadd.f32 %v3798_v43, %v3797_v7  ;;  %v5306_v43 = vpop.f32.mrf.mxu0 }
 0x314   : > { %v3800_v41 = vpop.f32.mrf.mxu1 }
 0x315   : > { %v3194_v56 = vadd.f32 %v3799_v2, %v3687_v9 }
 0x316   : > { %v3801_v3 = vpop.f32.mrf.mxu1 }
 0x317   : > { %3314 = vst [vmem:[%s5271_s11 + $0x10] sm:$0xff] %v3194_v56  ;;  %v3802_v52 = vadd.f32 %v3801_v3, %v3800_v41  ;;  %v5311_v56 = vpop.f32.mrf.mxu0 }
 0x318   : > { %v3803_v16 = vpop.f32.mrf.mxu1  ;;  %v3744_v26 = vadd.f32 %v5311_v56, %v5306_v43 }
 0x319   : > { %v3197_v1 = vadd.f32 %v3802_v52, %v3690_v49 }
 0x31a   : > { %v3804_v47 = vpop.f32.mrf.mxu1 }
 0x31b   : > { %3315 = vst [vmem:[%s5271_s11 + $0x18] sm:$0xff] %v3197_v1  ;;  %v3805_v11 = vadd.f32 %v3804_v47, %v3803_v16  ;;  %v5316_v16 = vpop.f32.mrf.mxu0 }
 0x31c   : > { %v3806_v5 = vpop.f32.mrf.mxu1 }
 0x31d   : > { %v3202_v8 = vadd.f32 %v3805_v11, %v3693_v34  ;;  %v5321_v11 = vpop.f32.mrf.mxu0 }
 0x31e   : > { %v3807_v60 = vpop.f32.mrf.mxu1  ;;  %v3747_v25 = vadd.f32 %v5321_v11, %v5316_v16 }
 0x31f   : > { %3316 = vst [vmem:[%s5271_s11 + $0x20] sm:$0xff] %v3202_v8  ;;  %v3808_v19 = vadd.f32 %v3807_v60, %v3806_v5 }
 0x320   : > { %v3809_v54 = vpop.f32.mrf.mxu1 }
 0x321   : > { %v3205_v20 = vadd.f32 %v3808_v19, %v3696_v32  ;;  %v5326_v32 = vpop.f32.mrf.mxu0 }
 0x322   : > { %v3810_v50 = vpop.f32.mrf.mxu1 }
 0x323   : > { %3317 = vst [vmem:[%s5271_s11 + $0x28] sm:$0xff] %v3205_v20  ;;  %v3811_v57 = vadd.f32 %v3810_v50, %v3809_v54  ;;  %v3749_v50 = vpop.f32.mrf.mxu0 }
 0x324   : > { %v3812_v55 = vpop.f32.mrf.mxu1 }
 0x325   : > { %v3210_v21 = vadd.f32 %v3811_v57, %v3699_v58 }
 0x326   : > { %v3813_v30 = vpop.f32.mrf.mxu1 }
 0x327   : > { %3318 = vst [vmem:[%s5271_s11 + $0x30] sm:$0xff] %v3210_v21  ;;  %v3814_v39 = vadd.f32 %v3813_v30, %v3812_v55  ;;  %v3751_v21 = vpop.f32.mrf.mxu0 }
 0x328   : > { %v3815_v35 = vpop.f32.mrf.mxu1 }
 0x329   : > { %v3213_v0 = vadd.f32 %v3814_v39, %v3702_v15 }
 0x32a   : > { %v3816_v36 = vpop.f32.mrf.mxu1 }
 0x32b   : > { %3319 = vst [vmem:[%s5271_s11 + $0x38] sm:$0xff] %v3213_v0  ;;  %v3817_v46 = vadd.f32 %v3816_v36, %v3815_v35  ;;  %v3752_v35 = vpop.f32.mrf.mxu0 }
 0x32c   : > { %v3818_v22 = vpop.f32.mrf.mxu1 }
 0x32d   : > { %v3218_v7 = vadd.f32 %v3817_v46, %v3705_v24  ;;  %v3754_v46 = vpop.f32.mrf.mxu0 }
 0x32e   : > { %v3819_v51 = vpop.f32.mrf.mxu1 }
 0x32f   : > { %3320 = vst [vmem:[%s5271_s11 + $0x40] sm:$0xff] %v3218_v7  ;;  %v3820_v13 = vadd.f32 %v3819_v51, %v3818_v22 }
 0x330   : > { %v3821_v9 = vpop.f32.mrf.mxu1 }
 0x331   : > { %v3221_v2 = vadd.f32 %v3820_v13, %v3708_v59  ;;  %v3755_v59 = vpop.f32.mrf.mxu0 }
 0x332   : > { %v3822_v41 = vpop.f32.mrf.mxu1 }
 0x333   : > { %3321 = vst [vmem:[%s5271_s11 + $0x48] sm:$0xff] %v3221_v2  ;;  %v3823_v61 = vadd.f32 %v3822_v41, %v3821_v9  ;;  %v3757_v41 = vpop.f32.mrf.mxu0 }
 0x334   : > { %v3824_v3 = vpop.f32.mrf.mxu1 }
 0x335   : > { %v3226_v49 = vadd.f32 %v3823_v61, %v3711_v17 }
 0x336   : > { %v3825_v52 = vpop.f32.mrf.mxu1 }
 0x337   : > { %3322 = vst [vmem:[%s5271_s11 + $0x50] sm:$0xff] %v3226_v49  ;;  %v3826_v27 = vadd.f32 %v3825_v52, %v3824_v3  ;;  %v3758_v49 = vpop.f32.mrf.mxu0 }
 0x338   : > { %v3827_v1 = vpop.f32.mrf.mxu1 }
 0x339   : > { %v3229_v47 = vadd.f32 %v3826_v27, %v3714_v53 }
 0x33a   : > { %v3828_v34 = vpop.f32.mrf.mxu1 }
 0x33b   : > { %3323 = vst [vmem:[%s5271_s11 + $0x58] sm:$0xff] %v3229_v47  ;;  %v3829_v31 = vadd.f32 %v3828_v34, %v3827_v1  ;;  %v3760_v1 = vpop.f32.mrf.mxu0 }
 0x33c   : > { %v3830_v5 = vpop.f32.mrf.mxu1 }
 0x33d   : > { %v3234_v8 = vadd.f32 %v3829_v31, %v3717_v33  ;;  %v3761_v31 = vpop.f32.mrf.mxu0 }
 0x33e   : > { %v3831_v60 = vpop.f32.mrf.mxu1 }
 0x33f   : > { %3324 = vst [vmem:[%s5271_s11 + $0x60] sm:$0xff] %v3234_v8  ;;  %v3832_v28 = vadd.f32 %v3831_v60, %v3830_v5  ;;  %v3763_v56 = vpop.f32.mrf.mxu0 }
 0x340   : > { %v3833_v19 = vpop.f32.mrf.mxu1 }
 0x341   : > { %v3237_v54 = vadd.f32 %v3832_v28, %v3720_v40  ;;  %v3750_v40 = vadd.f32 %v3749_v50, %v5326_v32  ;;  %v3764_v16 = vpop.f32.mrf.mxu0 }
 0x342   : > { %v3834_v20 = vpop.f32.mrf.mxu1 }
 0x343   : > { %3325 = vst [vmem:[%s5271_s11 + $0x68] sm:$0xff] %v3237_v54  ;;  %v3835_v63 = vadd.f32 %v3834_v20, %v3833_v19  ;;  %v3753_v20 = vadd.f32 %v3752_v35, %v3751_v21  ;;  %v3762_v35 = vadd.f32 %v3761_v31, %v3760_v1 }
 0x344   : > { %v3836_v58 = vpop.f32.mrf.mxu1 }
 0x345   : > { %v3242_v57 = vadd.f32 %v3835_v63, %v3723_v42 }
 0x346   : > { %v3837_v55 = vpop.f32.mrf.mxu1 }
 0x347   : > { %3326 = vst [vmem:[%s5271_s11 + $0x70] sm:$0xff] %v3242_v57  ;;  %v3838_v6 = vadd.f32 %v3837_v55, %v3836_v58  ;;  %v3756_v57 = vadd.f32 %v3755_v59, %v3754_v46  ;;  %v3765_v46 = vadd.f32 %v3764_v16, %v3763_v56 }
 0x348   : > { %v3839_v30 = vpop.f32.mrf.mxu1 }
 0x349   : > { %v3245_v15 = vadd.f32 %v3838_v6, %v3726_v29  ;;  %v3766_v29 = vpop.f32.mrf.mxu0 }
 0x34a   : > { %v3840_v39 = vpop.f32.mrf.mxu1 }
 0x34b   : > { %3327 = vst [vmem:[%s5271_s11 + $0x78] sm:$0xff] %v3245_v15  ;;  %v3841_v62 = vadd.f32 %v3840_v39, %v3839_v30  ;;  %v3759_v30 = vadd.f32 %v3758_v49, %v3757_v41  ;;  %v3767_v39 = vpop.f32.mrf.mxu0 }
 0x34c   : > { %v3842_v0 = vpop.f32.mrf.mxu1  ;;  %v3768_v59 = vadd.f32 %v3767_v39, %v3766_v29 }
 0x34d   : > { %v3250_v36 = vadd.f32 %v3841_v62, %v3729_v48 }
 0x34e   : > { %v3843_v24 = vpop.f32.mrf.mxu1 }
 0x34f   : > { %3328 = vst [vmem:[%s5271_s11 + $0x80] sm:$0xff] %v3250_v36  ;;  %v3844_v44 = vadd.f32 %v3843_v24, %v3842_v0  ;;  %v3769_v36 = vpop.f32.mrf.mxu0 }
 0x350   : > { %v3845_v22 = vpop.f32.mrf.mxu1 }
 0x351   : > { %v3253_v7 = vadd.f32 %v3844_v44, %v3732_v45 }
 0x352   : > { %v3846_v51 = vpop.f32.mrf.mxu1 }
 0x353   : > { %3329 = vst [vmem:[%s5271_s11 + $0x88] sm:$0xff] %v3253_v7  ;;  %v3847_v38 = vadd.f32 %v3846_v51, %v3845_v22  ;;  %v3770_v7 = vpop.f32.mrf.mxu0 }
 0x354   : > { %v3848_v13 = vpop.f32.mrf.mxu1  ;;  %v3771_v41 = vadd.f32 %v3770_v7, %v3769_v36 }
 0x355   : > { %v3258_v9 = vadd.f32 %v3847_v38, %v3735_v10 }
 0x356   : > { %v3849_v2 = vpop.f32.mrf.mxu1 }
 0x357   : > { %3330 = vst [vmem:[%s5271_s11 + $0x90] sm:$0xff] %v3258_v9  ;;  %v3850_v18 = vadd.f32 %v3849_v2, %v3848_v13  ;;  %v3772_v9 = vpop.f32.mrf.mxu0 }
 0x358   : > { %v3851_v17 = vpop.f32.mrf.mxu1 }
 0x359   : > { %v3261_v61 = vadd.f32 %v3850_v18, %v3738_v12 }
 0x35a   : > { %v3852_v3 = vpop.f32.mrf.mxu1 }
 0x35b   : > { %3331 = vst [vmem:[%s5271_s11 + $0x98] sm:$0xff] %v3261_v61  ;;  %v3853_v23 = vadd.f32 %v3852_v3, %v3851_v17  ;;  %v3773_v61 = vpop.f32.mrf.mxu0 }
 0x35c   : > { %v3854_v52 = vpop.f32.mrf.mxu1  ;;  %v3774_v49 = vadd.f32 %v3773_v61, %v3772_v9 }
 0x35d   : > { %v3266_v53 = vadd.f32 %v3853_v23, %v3741_v37 }
 0x35e   : > { %v3855_v27 = vpop.f32.mrf.mxu1 }
 0x35f   : > { %3332 = vst [vmem:[%s5271_s11 + $0xa0] sm:$0xff] %v3266_v53  ;;  %v3856_v14 = vadd.f32 %v3855_v27, %v3854_v52 }
 0x360   : > { %v3857_v47 = vpop.f32.mrf.mxu1 }
 0x361   : > { %v3269_v34 = vadd.f32 %v3856_v14, %v3744_v26 }
 0x362   : > { %v3858_v33 = vpop.f32.mrf.mxu1 }
 0x363   : > { %3333 = vst [vmem:[%s5271_s11 + $0xa8] sm:$0xff] %v3269_v34  ;;  %v3859_v4 = vadd.f32 %v3858_v33, %v3857_v47 }
 0x364   : > { %v3860_v5 = vpop.f32.mrf.mxu1 }
 0x365   : > { %v3274_v8 = vadd.f32 %v3859_v4, %v3747_v25 }
 0x366   : > { %v3861_v60 = vpop.f32.mrf.mxu1 }
 0x367   : > { %3334 = vst [vmem:[%s5271_s11 + $0xb0] sm:$0xff] %v3274_v8  ;;  %v3862_v43 = vadd.f32 %v3861_v60, %v3860_v5 }
 0x368   : > { %v3863_v28 = vpop.f32.mrf.mxu1 }
 0x369   : > { %v3277_v19 = vadd.f32 %v3862_v43, %v3750_v40 }
 0x36a   : > { %v3864_v54 = vpop.f32.mrf.mxu1 }
 0x36b   : > { %3335 = vst [vmem:[%s5271_s11 + $0xb8] sm:$0xff] %v3277_v19  ;;  %v3865_v42 = vadd.f32 %v3864_v54, %v3863_v28 }
 0x36c   : > { %v3866_v11 = vpop.f32.mrf.mxu1 }
 0x36d   : > { %v3282_v63 = vadd.f32 %v3865_v42, %v3753_v20 }
 0x36e   : > { %v3867_v58 = vpop.f32.mrf.mxu1 }
 0x36f   : > { %3336 = vst [vmem:[%s5271_s11 + $0xc0] sm:$0xff] %v3282_v63  ;;  %v3868_v55 = vadd.f32 %v3867_v58, %v3866_v11 }
 0x370   : > { %v3869_v32 = vpop.f32.mrf.mxu1 }
 0x371   : > { %v3285_v50 = vadd.f32 %v3868_v55, %v3756_v57 }
 0x372   : > { %v3870_v6 = vpop.f32.mrf.mxu1 }
 0x373   : > { %3337 = vst [vmem:[%s5271_s11 + $0xc8] sm:$0xff] %v3285_v50  ;;  %v3871_v15 = vadd.f32 %v3870_v6, %v3869_v32 }
 0x374   : > { %v3872_v21 = vpop.f32.mrf.mxu1 }
 0x375   : > { %v3290_v48 = vadd.f32 %v3871_v15, %v3759_v30 }
 0x376   : > { %v3873_v62 = vpop.f32.mrf.mxu1 }
 0x377   : > { %3338 = vst [vmem:[%s5271_s11 + $0xd0] sm:$0xff] %v3290_v48  ;;  %v3874_v0 = vadd.f32 %v3873_v62, %v3872_v21 }
 0x378   : > { %v3875_v24 = vpop.f32.mrf.mxu1 }
 0x379   : > { %v3293_v45 = vadd.f32 %v3874_v0, %v3762_v35 }
 0x37a   : > { %v3876_v44 = vpop.f32.mrf.mxu1 }
 0x37b   : > { %3339 = vst [vmem:[%s5271_s11 + $0xd8] sm:$0xff] %v3293_v45  ;;  %v3877_v22 = vadd.f32 %v3876_v44, %v3875_v24 }
 0x37c   : > { %v3878_v51 = vpop.f32.mrf.mxu1 }
 0x37d   : > { %v3298_v10 = vadd.f32 %v3877_v22, %v3765_v46 }
 0x37e   : > { %v3879_v38 = vpop.f32.mrf.mxu1 }
 0x37f   : > { %3340 = vst [vmem:[%s5271_s11 + $0xe0] sm:$0xff] %v3298_v10  ;;  %v3880_v13 = vadd.f32 %v3879_v38, %v3878_v51 }
 0x380   : > { %v3881_v2 = vpop.f32.mrf.mxu1 }
 0x381   : > { %v3301_v12 = vadd.f32 %v3880_v13, %v3768_v59 }
 0x382   : > { %v3882_v18 = vpop.f32.mrf.mxu1 }
 0x383   : > { %3341 = vst [vmem:[%s5271_s11 + $0xe8] sm:$0xff] %v3301_v12  ;;  %v3883_v17 = vadd.f32 %v3882_v18, %v3881_v2 }
 0x384   : > { %v3884_v3 = vpop.f32.mrf.mxu1 }
 0x385   : > { %v3306_v37 = vadd.f32 %v3883_v17, %v3771_v41 }
 0x386   : > { %v3885_v23 = vpop.f32.mrf.mxu1 }
 0x387   : > { %3342 = vst [vmem:[%s5271_s11 + $0xf0] sm:$0xff] %v3306_v37  ;;  %v3886_v52 = vadd.f32 %v3885_v23, %v3884_v3 }
 0x389   : > { %v3309_v53 = vadd.f32 %v3886_v52, %v3774_v49 }
 0x38b   : > { %3343 = vst [vmem:[%s5271_s11 + $0xf8] sm:$0xff] %v3309_v53 }
 0x38c   : > { %4233 = shalt.err (!%p4230_p0)
}
 0x38d   : > { %s4234_s30 = scalar_lea.hbm %s5370_s22, 4096  ;;  %s4238_s7 = scalar_lea.hbm %s5421_s4, 8192 }
 0x38e   : > { %p4235_p1 = scmp.ne.s32.totalorder %s5370_s22, %s4234_s30  ;;  %p4239_p4 = scmp.lt.s32.totalorder %s5370_s22, %s5421_s4 }
 0x38f   : > { %p4240_p7 = scmp.lt.s32.totalorder %s4238_s7, %s4234_s30 }
 0x390   : > { %p4236_p2 = pnand %p4235_p1, %p4356_p5 }
 0x391   : > { %p4241_p6 = por %p4240_p7, %p4239_p4 }
 0x392   : > { %p4237_p3 = pneg %p4236_p2 }
 0x394   : > { %p4242_p8 = pnand %p4241_p6, %p4237_p3 }
 0x396   : > { %4245 = shalt.err (!%p4242_p8)
}
 0x397   : > { %s4291_s10 = smov 128   ;;  %s4292_s11 = smov 8  }
 0x398   : > { %3891 = dma.vmem_to_hbm [thread:$0]  (%p4356_p5), %s5372_s13, 4096, %s5370_s22, %s5377_s23, %s4291_s10, %s4291_s10, %s4292_s11  }
 0x399 PF: > { %p3903_p9 = scmp.ge.s32.totalorder %s4284_s18, 2  ;;  %s3373_s12 = sand.u32 1, %s4272_s15  }
 0x39a   : > { %p5481_p10 = scmp.ne.s32.totalorder %s5439_s26, 0  ;;  %s3374_s14 = scalar_lea.sflag [#allocation4], %s3373_s12 }
 0x39c   : > { %p3898_p11 = pnand %p3903_p9, %p5481_p10 }
 0x39e   : > { %p3899_p12 = pneg %p3898_p11 }
 0x3a0   : > { %4267 = dma.done.wait (%p3899_p12), %s3374_s14, 4096  }
 0x3a1   : > { %4269 = vsyncadd (%p3899_p12), %s3374_s14, 4294963200  ;;  %p15_p13 = scmp.ge.s32.totalorder %s4343_s21, 4   ;;  %s5482_s15 = smov %s4276_s16 }
 0x3a2   : > { %s5483_s16 = smov %s4280_s17  ;;  %s5484_s17 = smov %s4354_s24 }
 0x3a3   : > { %s5485_s18 = smov %s4343_s21  ;;  %17 = sbr.rel (!%p15_p13) target bundleno = 4 (0x4), region = 76 }
 0x3a8   :  { %3379 = vsyncpa [#allocation3], 1 }
 0x3a9   :  { %3381 = vsyncpa [#allocation3 + $0x1], 1 }
 0x3aa   :  { %3382 = vsyncpa [#allocation4], 1 }
 0x3ab   :  { %3384 = vsyncpa [#allocation4 + $0x1], 1 }

</bundles_post_ra>
